<compile_context>
chip_gen: v6e
topology: v6e:2x2x1
jax: 0.10.0
libtpu: 0.0.40
codegen_flags: <defaults>
</compile_context>

<pallas_src>
import jax
import jax.numpy as jnp
from jax import lax
from jax.experimental import pallas as pl
from jax.experimental.pallas import tpu as pltpu
import numpy as np

K = 4          # kernel_size
S = 2          # stride
P = 1          # padding
BN_EPS = 1e-5


def _vmem_limit_bytes():
    """Generation-aware scoped-VMEM budget (kernel itself needs < 2 MiB)."""
    try:
        cap = pltpu.get_tpu_info().vmem_capacity_bytes
    except Exception:
        cap = 64 * 1024 * 1024
    return min(int(cap * 3 // 4), 64 * 1024 * 1024)


_VMEM_LIMIT = _vmem_limit_bytes()


# ----------------------------------------------------------------------------- weight prep
def _banded_weight3(weight, W):
    """ConvTranspose2d weight (Cin, Cout, 4, 4) -> banded matrix (3*(W+2)*Cin, 4*W*Cout).

    Row index    = r*WpC + jx*Cin + ci   with r  = py + dy (input-row shift) and
                                              jx = l + px + dx (padded width index).
    Column index = py*(2*W*Cout) + l*(2*Cout) + px*Cout + co -- ordered so the
    packed kernel output reshapes straight to NHWC for free.
    The spatial kernel flip / polyphase tap selection (ky = 3-py-2dy,
    kx = 3-px-2dx) is baked into the band placement; the 75%-zero dilated input
    is never materialized and no MACs are spent on structural zeros of the phases.
    """
    Cin, Cout = weight.shape[0], weight.shape[1]
    WpC = (W + 2) * Cin
    OWC = 4 * W * Cout
    w3 = jnp.zeros((3 * WpC, OWC), jnp.float32)
    l = jnp.arange(W)
    ci = jnp.arange(Cin)
    co = jnp.arange(Cout)
    for py in range(2):
        for dy in range(2):
            r = py + dy
            ky = 3 - py - 2 * dy
            for px in range(2):
                for dx in range(2):
                    kx = 3 - px - 2 * dx
                    tap = weight[:, :, ky, kx]                          # (Cin, Cout)
                    rows = (r * WpC
                            + (l[:, None, None] + px + dx) * Cin
                            + ci[None, :, None])                        # (W, Cin, 1)
                    cols = (py * (2 * W * Cout)
                            + l[:, None, None] * (2 * Cout)
                            + px * Cout
                            + co[None, None, :])                        # (W, 1, Cout)
                    vals = jnp.broadcast_to(tap[None, :, :], (W, Cin, Cout))
                    w3 = w3.at[rows, cols].set(vals)
    return w3.astype(jnp.bfloat16)


# ----------------------------------------------------------------------------- fused op
@jax.jit
def deconv_block(x_nchw, weight, bias, gamma, beta):
    """DeconvBlock forward. x: (N, Cin, H, W), weight: (Cin, Cout, 4, 4) -> (N, Cout, 2H, 2W).

    `bias` is accepted for API parity but unused: a per-channel constant added
    before training-mode BatchNorm is exactly cancelled by the mean subtraction.
    """
    del bias
    N, Cin, H, W = x_nchw.shape
    Cout = weight.shape[1]
    OH, OW = S * H, S * W
    Hp, WpC = H + 2, (W + 2) * Cin
    M3 = N * H                      # batch folded into the matmul M dimension
    K3 = 3 * WpC                    # 3 input-row shifts folded into contraction
    OWC = 2 * OW * Cout             # packed (py, l, px, co) lane dimension

    # --- XLA prep (tiny): bf16 cast first, NHWC, halo pad, width/Cin pack, 3-shift concat.
    x = jnp.transpose(x_nchw.astype(jnp.bfloat16), (0, 2, 3, 1))        # (N, H, W, Cin)
    xpad = jnp.pad(x, ((0, 0), (1, 1), (1, 1), (0, 0)))                 # (N, Hp, W+2, Cin)
    x2 = xpad.reshape(N, Hp, WpC)
    x3 = jnp.concatenate([x2[:, 0:H], x2[:, 1:H + 1], x2[:, 2:H + 2]], axis=-1)
    x3 = x3.reshape(M3, K3)                                             # (N*H, 3*WpC) bf16

    w3 = _banded_weight3(weight, W)                                     # (K3, OWC) bf16

    # 0/1 "same output channel" matrix: folds per-lane stats to per-channel and
    # broadcasts them back to every lane of that channel in one matmul
    # (co is innermost in the packed lane layout).
    ch = jnp.arange(OWC) % Cout
    same_ch = (ch[:, None] == ch[None, :]).astype(jnp.float32)          # (OWC, OWC)

    # gamma / beta expanded to the packed lane layout (exact, O(OWC) glue).
    gamma_w = jnp.tile(gamma.astype(jnp.float32), OWC // Cout).reshape(1, OWC)
    beta_w = jnp.tile(beta.astype(jnp.float32), OWC // Cout).reshape(1, OWC)

    inv_cnt = 1.0 / float(N * OH * OW)

    def fused_kernel(x3_ref, w3_ref, m_ref, gamma_ref, beta_ref, o_ref):
        # Transposed conv for the whole batch: ONE MXU matmul, f32 accumulation.
        acc = jnp.dot(x3_ref[...], w3_ref[...],
                      preferred_element_type=jnp.float32)               # (M3, OWC)
        # BatchNorm batch statistics (training mode), centered two-pass form.
        fold = jnp.dot(acc, m_ref[...], preferred_element_type=jnp.float32)
        mean_w = jnp.sum(fold, axis=0, keepdims=True) * inv_cnt          # per-lane mean
        d = acc - mean_w
        foldv = jnp.dot(d * d, m_ref[...], preferred_element_type=jnp.float32)
        var_w = jnp.sum(foldv, axis=0, keepdims=True) * inv_cnt          # per-lane var
        scale_w = gamma_ref[...] * lax.rsqrt(var_w + BN_EPS)
        y = d * scale_w + beta_ref[...]
        # ELU (alpha = 1), overflow-safe.
        o_ref[...] = jnp.where(y > 0.0, y, jnp.exp(jnp.minimum(y, 0.0)) - 1.0)

    out_packed = pl.pallas_call(
        fused_kernel,
        out_shape=jax.ShapeDtypeStruct((M3, OWC), jnp.float32),
        grid=(1,),
        in_specs=[
            pl.BlockSpec((M3, K3), lambda i: (0, 0)),
            pl.BlockSpec((K3, OWC), lambda i: (0, 0)),
            pl.BlockSpec((OWC, OWC), lambda i: (0, 0)),
            pl.BlockSpec((1, OWC), lambda i: (0, 0)),
            pl.BlockSpec((1, OWC), lambda i: (0, 0)),
        ],
        out_specs=pl.BlockSpec((M3, OWC), lambda i: (0, 0)),
        compiler_params=pltpu.CompilerParams(
            dimension_semantics=("arbitrary",),
            vmem_limit_bytes=_VMEM_LIMIT),
    )(x3, w3, same_ch, gamma_w, beta_w)

    # Packed (n*m, (py,l,px,co)) -> NHWC is a free reshape (oh = 2m+py, ow = 2l+px);
    # only the final NCHW permute (API parity with PyTorch) remains in XLA.
    out_nhwc = out_packed.reshape(N, OH, OW, Cout)
    return jnp.transpose(out_nhwc, (0, 3, 1, 2))


# ----------------------------------------------------------------------------- reference
def reference(x_nchw, weight, bias, gamma, beta):
    """Pure-JAX reference (conv_transpose via lax.conv_general_dilated).

    Matmul operands are quantized to bf16 exactly like the kernel, so the
    comparison isolates kernel correctness from the intentional bf16 cast.
    """
    x = jnp.transpose(x_nchw, (0, 2, 3, 1)).astype(jnp.bfloat16).astype(jnp.float32)
    wq = weight.astype(jnp.bfloat16).astype(jnp.float32)
    rhs = jnp.transpose(jnp.flip(wq, axis=(2, 3)), (2, 3, 0, 1))   # HWIO
    pad = K - 1 - P
    y = lax.conv_general_dilated(
        x, rhs, window_strides=(1, 1), padding=((pad, pad), (pad, pad)),
        lhs_dilation=(S, S), dimension_numbers=('NHWC', 'HWIO', 'NHWC'))
    y = y + bias
    mean = jnp.mean(y, axis=(0, 1, 2), keepdims=True)
    var = jnp.mean((y - mean) ** 2, axis=(0, 1, 2), keepdims=True)
    y = (y - mean) / jnp.sqrt(var + BN_EPS)
    y = y * gamma + beta
    y = jnp.where(y > 0, y, jnp.exp(jnp.minimum(y, 0.0)) - 1.0)
    return jnp.transpose(y, (0, 3, 1, 2))


if __name__ == "__main__":
    key = jax.random.PRNGKey(0)
    k_x, k_w, k_b, k_g, k_be = jax.random.split(key, 5)

    Nb, Cin, Cout, H, W = 2, 4, 8, 16, 16

    x = jax.random.normal(k_x, (Nb, Cin, H, W), jnp.float32)
    # ConvTranspose2d weight shape: (in_channels, out_channels, kH, kW)
    weight = 0.1 * jax.random.normal(k_w, (Cin, Cout, K, K), jnp.float32)
    bias = 0.1 * jax.random.normal(k_b, (Cout,), jnp.float32)
    gamma = 1.0 + 0.1 * jax.random.normal(k_g, (Cout,), jnp.float32)
    beta = 0.1 * jax.random.normal(k_be, (Cout,), jnp.float32)

    out = jax.block_until_ready(deconv_block(x, weight, bias, gamma, beta))
    ref = jax.block_until_ready(reference(x, weight, bias, gamma, beta))

    assert out.shape == (Nb, Cout, S * H, S * W), out.shape
    np.testing.assert_allclose(np.asarray(out), np.asarray(ref),
                               rtol=1e-3, atol=1e-3)
    print("KERNEL_OK")
</pallas_src>

<mosaic_0001>
module attributes {stable_mosaic.version = 11 : i64} {
  func.func @fused_kernel(%arg0: i32, %arg1: memref<32x216xbf16, #tpu.memory_space<vmem>>, %arg2: memref<216x512xbf16, #tpu.memory_space<vmem>>, %arg3: memref<512x512xf32, #tpu.memory_space<vmem>>, %arg4: memref<1x512xf32, #tpu.memory_space<vmem>>, %arg5: memref<1x512xf32, #tpu.memory_space<vmem>>, %arg6: memref<32x512xf32, #tpu.memory_space<vmem>>) attributes {dimension_semantics = [#tpu.dimension_semantics<arbitrary>], iteration_bounds = array<i64: 1>, scalar_prefetch = 0 : i64, scratch_operands = 0 : i64, tpu.core_type = #tpu.core_type<tc>, window_params = [{pipeline_mode = #tpu.pipeline_mode<synchronous>, transform_indices = @transform_0, window_bounds = array<i64: 32, 216>}, {pipeline_mode = #tpu.pipeline_mode<synchronous>, transform_indices = @transform_1, window_bounds = array<i64: 216, 512>}, {pipeline_mode = #tpu.pipeline_mode<synchronous>, transform_indices = @transform_2, window_bounds = array<i64: 512, 512>}, {pipeline_mode = #tpu.pipeline_mode<synchronous>, transform_indices = @transform_3, window_bounds = array<i64: 1, 512>}, {pipeline_mode = #tpu.pipeline_mode<synchronous>, transform_indices = @transform_4, window_bounds = array<i64: 1, 512>}, {pipeline_mode = #tpu.pipeline_mode<synchronous>, transform_indices = @transform_5, window_bounds = array<i64: 32, 512>}]} {
    %c0 = arith.constant 0 : index
    %c0_0 = arith.constant 0 : index
    %0 = vector.load %arg1[%c0, %c0_0] : memref<32x216xbf16, #tpu.memory_space<vmem>>, vector<32x216xbf16>
    %c0_1 = arith.constant 0 : index
    %c0_2 = arith.constant 0 : index
    %1 = vector.load %arg2[%c0_1, %c0_2] : memref<216x512xbf16, #tpu.memory_space<vmem>>, vector<216x512xbf16>
    %cst = arith.constant dense<0.000000e+00> : vector<32x512xf32>
    %2 = tpu.matmul %0, %1, %cst {dimension_numbers = #tpu.dot_dimension_numbers<[1], [0], [0], [1], [0, 0, 1, 1], [], []>} : vector<32x216xbf16>, vector<216x512xbf16>, vector<32x512xf32> -> vector<32x512xf32>
    %c0_3 = arith.constant 0 : index
    %c0_4 = arith.constant 0 : index
    %3 = vector.load %arg3[%c0_3, %c0_4] : memref<512x512xf32, #tpu.memory_space<vmem>>, vector<512x512xf32>
    %cst_5 = arith.constant dense<0.000000e+00> : vector<32x512xf32>
    %4 = tpu.matmul %2, %3, %cst_5 {dimension_numbers = #tpu.dot_dimension_numbers<[1], [0], [0], [1], [0, 0, 1, 1], [], []>} : vector<32x512xf32>, vector<512x512xf32>, vector<32x512xf32> -> vector<32x512xf32>
    %cst_6 = arith.constant dense<0.000000e+00> : vector<512xf32>
    %5 = vector.multi_reduction <add>, %4, %cst_6 [0] : vector<32x512xf32> to vector<512xf32>
    %6 = vector.shape_cast %5 : vector<512xf32> to vector<1x512xf32>
    %cst_7 = arith.constant 4.8828125E-4 : f32
    %7 = vector.broadcast %cst_7 : f32 to vector<1x512xf32>
    %8 = arith.mulf %6, %7 : vector<1x512xf32>
    %9 = vector.broadcast %8 : vector<1x512xf32> to vector<32x512xf32>
    %10 = arith.subf %2, %9 : vector<32x512xf32>
    %11 = arith.mulf %10, %10 : vector<32x512xf32>
    %c0_8 = arith.constant 0 : index
    %c0_9 = arith.constant 0 : index
    %12 = vector.load %arg3[%c0_8, %c0_9] : memref<512x512xf32, #tpu.memory_space<vmem>>, vector<512x512xf32>
    %cst_10 = arith.constant dense<0.000000e+00> : vector<32x512xf32>
    %13 = tpu.matmul %11, %12, %cst_10 {dimension_numbers = #tpu.dot_dimension_numbers<[1], [0], [0], [1], [0, 0, 1, 1], [], []>} : vector<32x512xf32>, vector<512x512xf32>, vector<32x512xf32> -> vector<32x512xf32>
    %cst_11 = arith.constant dense<0.000000e+00> : vector<512xf32>
    %14 = vector.multi_reduction <add>, %13, %cst_11 [0] : vector<32x512xf32> to vector<512xf32>
    %15 = vector.shape_cast %14 : vector<512xf32> to vector<1x512xf32>
    %cst_12 = arith.constant 4.8828125E-4 : f32
    %16 = vector.broadcast %cst_12 : f32 to vector<1x512xf32>
    %17 = arith.mulf %15, %16 : vector<1x512xf32>
    %c0_13 = arith.constant 0 : index
    %c0_14 = arith.constant 0 : index
    %18 = vector.load %arg4[%c0_13, %c0_14] : memref<1x512xf32, #tpu.memory_space<vmem>>, vector<1x512xf32>
    %cst_15 = arith.constant 9.99999974E-6 : f32
    %19 = vector.broadcast %cst_15 : f32 to vector<1x512xf32>
    %20 = arith.addf %17, %19 : vector<1x512xf32>
    %21 = math.rsqrt %20 : vector<1x512xf32>
    %22 = arith.mulf %18, %21 : vector<1x512xf32>
    %23 = vector.broadcast %22 : vector<1x512xf32> to vector<32x512xf32>
    %24 = arith.mulf %10, %23 : vector<32x512xf32>
    %c0_16 = arith.constant 0 : index
    %c0_17 = arith.constant 0 : index
    %25 = vector.load %arg5[%c0_16, %c0_17] : memref<1x512xf32, #tpu.memory_space<vmem>>, vector<1x512xf32>
    %26 = vector.broadcast %25 : vector<1x512xf32> to vector<32x512xf32>
    %27 = arith.addf %24, %26 : vector<32x512xf32>
    %cst_18 = arith.constant 0.000000e+00 : f32
    %28 = vector.broadcast %cst_18 : f32 to vector<32x512xf32>
    %29 = arith.cmpf ogt, %27, %28 : vector<32x512xf32>
    %cst_19 = arith.constant 0.000000e+00 : f32
    %30 = vector.broadcast %cst_19 : f32 to vector<32x512xf32>
    %31 = arith.minimumf %27, %30 : vector<32x512xf32>
    %32 = math.exp %31 : vector<32x512xf32>
    %cst_20 = arith.constant 1.000000e+00 : f32
    %33 = vector.broadcast %cst_20 : f32 to vector<32x512xf32>
    %34 = arith.subf %32, %33 : vector<32x512xf32>
    %35 = arith.select %29, %27, %34 : vector<32x512xi1>, vector<32x512xf32>
    %c0_21 = arith.constant 0 : index
    %c0_22 = arith.constant 0 : index
    %36 = vector.load %arg6[%c0_21, %c0_22] : memref<32x512xf32, #tpu.memory_space<vmem>>, vector<32x512xf32>
    tpu.vector_store %arg6[%c0_21, %c0_22], %35 {strides = array<i32>} : memref<32x512xf32, #tpu.memory_space<vmem>>, vector<32x512xf32>,
    return
  }
  func.func @transform_0(%arg0: i32) -> (i32, i32) {
    %c0_i32 = arith.constant 0 : i32
    %c0_i32_0 = arith.constant 0 : i32
    %c0_i32_1 = arith.constant 0 : i32
    return %c0_i32, %c0_i32_0 : i32, i32
  }
  func.func @transform_1(%arg0: i32) -> (i32, i32) {
    %c0_i32 = arith.constant 0 : i32
    %c0_i32_0 = arith.constant 0 : i32
    %c0_i32_1 = arith.constant 0 : i32
    return %c0_i32, %c0_i32_0 : i32, i32
  }
  func.func @transform_2(%arg0: i32) -> (i32, i32) {
    %c0_i32 = arith.constant 0 : i32
    %c0_i32_0 = arith.constant 0 : i32
    %c0_i32_1 = arith.constant 0 : i32
    return %c0_i32, %c0_i32_0 : i32, i32
  }
  func.func @transform_3(%arg0: i32) -> (i32, i32) {
    %c0_i32 = arith.constant 0 : i32
    %c0_i32_0 = arith.constant 0 : i32
    %c0_i32_1 = arith.constant 0 : i32
    return %c0_i32, %c0_i32_0 : i32, i32
  }
  func.func @transform_4(%arg0: i32) -> (i32, i32) {
    %c0_i32 = arith.constant 0 : i32
    %c0_i32_0 = arith.constant 0 : i32
    %c0_i32_1 = arith.constant 0 : i32
    return %c0_i32, %c0_i32_0 : i32, i32
  }
  func.func @transform_5(%arg0: i32) -> (i32, i32) {
    %c0_i32 = arith.constant 0 : i32
    %c0_i32_0 = arith.constant 0 : i32
    %c0_i32_1 = arith.constant 0 : i32
    return %c0_i32, %c0_i32_0 : i32, i32
  }
}

</mosaic_0001>

<bundles_post_ra>
// kernel: tile.13
= control target key start
LH: loop header
LB: loop body
LE: loop exit
PB: predicated region body
PF: predicated region fallthrough
CT: control target
= control target key end

     0   :  { %s64_s0 = inlined_call_operand.vmem [shape: f32[8], index: 0, kind: input, shape index: {}]   ;;  %s65_s1 = inlined_call_operand.vmem [shape: f32[64,8], index: 1, kind: output, shape index: {}]  }
   0x1   :  { %v4_v0 = vld [vmem:[%s64_s0] ss:$0 sm:$0xff] }
   0x2   :  { %5 = vst [vmem:[%s65_s1] sm:$0xff] %v4_v0  ;;  %20 = vst [vmem:[%s65_s1 + $0x8] sm:$0xff] %v4_v0 }
   0x3   :  { %21 = vst [vmem:[%s65_s1 + $0x10] sm:$0xff] %v4_v0  ;;  %22 = vst [vmem:[%s65_s1 + $0x18] sm:$0xff] %v4_v0 }
   0x4   :  { %23 = vst [vmem:[%s65_s1 + $0x20] sm:$0xff] %v4_v0  ;;  %24 = vst [vmem:[%s65_s1 + $0x28] sm:$0xff] %v4_v0 }
   0x5   :  { %25 = vst [vmem:[%s65_s1 + $0x30] sm:$0xff] %v4_v0  ;;  %26 = vst [vmem:[%s65_s1 + $0x38] sm:$0xff] %v4_v0 }

// kernel: tile.14
= control target key start
LH: loop header
LB: loop body
LE: loop exit
PB: predicated region body
PF: predicated region fallthrough
CT: control target
= control target key end

     0   :  { %vm7_vm0 = vcmask 1043458   ;;  %s12_s6 = smov 3  ;;  %s15_s7 = smov 12  ;;  %s440_s0 = inlined_call_operand.vmem [shape: f32[64,8], index: 0, kind: input, shape index: {}]   ;;  %s441_s1 = inlined_call_operand.hbm [shape: f32[1,512], index: 1, kind: output, shape index: {}]  }
   0x1   :  { %v231_v0 = vld [vmem:[%s440_s0 + $0xf] ss:$16 sm:%s12_s6]   ;;  %s36_s12 = smov 3  ;;  %s39_s15 = smov 12 }
   0x2   :  { %v232_v1 = vld [vmem:[%s440_s0 + $0xf] ss:$16 sm:%s15_s7]   ;;  %v235_v3 = vld [vmem:[%s440_s0 + $0xd] ss:$16 sm:%s36_s12]   ;;  %s299_s16 = smov 120   ;;  %s24_s19 = smov 3 }
   0x3   :  { %v18_v2 = vsel %vm7_vm0, %v232_v1, %v231_v0  ;;  %v236_v4 = vld [vmem:[%s440_s0 + $0xd] ss:$16 sm:%s39_s15]   ;;  %s27_s20 = smov 12  ;;  %v233_v6 = vld [vmem:[%s440_s0 + $0xe] ss:$16 sm:%s24_s19]   ;;  %s48_s25 = smov 3 }
   0x4   :  { %19 = vrot.lane.b32.xlu0 %v18_v2, %s299_s16  ;;  %v42_v5 = vsel %vm7_vm0, %v236_v4, %v235_v3  ;;  %v234_v7 = vld [vmem:[%s440_s0 + $0xe] ss:$16 sm:%s27_s20]   ;;  %s300_s26 = smov 104   ;;  %s51_s29 = smov 12 }
   0x5   :  { %43 = vrot.lane.b32.xlu1 %v42_v5, %s300_s26  ;;  %v30_v8 = vsel %vm7_vm0, %v234_v7, %v233_v6  ;;  %v237_v9 = vld [vmem:[%s440_s0 + $0xc] ss:$16 sm:%s48_s25]   ;;  %s60_s3 = smov 3  ;;  %s63_s4 = smov 12 }
   0x6   :  { %v238_v10 = vld [vmem:[%s440_s0 + $0xc] ss:$16 sm:%s51_s29]   ;;  %s301_s5 = smov 112   ;;  %v239_v12 = vld [vmem:[%s440_s0 + $0xb] ss:$16 sm:%s60_s3]   ;;  %s72_s8 = smov 3 }
   0x7   :  { %v54_v11 = vsel %vm7_vm0, %v238_v10, %v237_v9 }
   0x8   :  { %31 = vrot.lane.b32.xlu0 %v30_v8, %s301_s5 }
   0x9   :  { %2 = vsyncpa [#allocation1], 0  ;;  %v240_v13 = vld [vmem:[%s440_s0 + $0xb] ss:$16 sm:%s63_s4]   ;;  %v241_v14 = vld [vmem:[%s440_s0 + $0xa] ss:$16 sm:%s72_s8]  }
   0xa   :  { %s75_s13 = smov 12  ;;  %s302_s14 = smov 96   ;;  %v66_v15 = vsel %vm7_vm0, %v240_v13, %v239_v12  ;;  %vm9_vm1 = vcmask 64512   ;;  %vm21_vm2 = vcmask 1048512   ;;  %vm33_vm3 = vcmask 982912  }
   0xb   :  { %55 = vrot.lane.b32.xlu1 %v54_v11, %s302_s14  ;;  %v242_v16 = vld [vmem:[%s440_s0 + $0xa] ss:$16 sm:%s75_s13]   ;;  %s84_s17 = smov 3  ;;  %s87_s18 = smov 12  ;;  %vm45_vm4 = vcmask 917312   ;;  %vm57_vm5 = vcmask 851712  }
   0xc   :  { %v78_v17 = vsel %vm7_vm0, %v242_v16, %v241_v14  ;;  %v243_v18 = vld [vmem:[%s440_s0 + $0x9] ss:$16 sm:%s84_s17]   ;;  %s96_s23 = smov 3  ;;  %s303_s24 = smov 88   ;;  %vm69_vm6 = vcmask 786112   ;;  %vm81_vm7 = vcmask 720512  }
   0xd   :  { %v244_v19 = vld [vmem:[%s440_s0 + $0x9] ss:$16 sm:%s87_s18]   ;;  %67 = vrot.lane.b32.xlu0 %v66_v15, %s303_s24  ;;  %s99_s27 = smov 12  ;;  %s108_s30 = smov 3  ;;  %vm93_vm8 = vcmask 654912   ;;  %vm105_vm9 = vcmask 589312  }
   0xe   :  { %v245_v20 = vld [vmem:[%s440_s0 + $0x8] ss:$16 sm:%s96_s23]   ;;  %v90_v21 = vsel %vm7_vm0, %v244_v19, %v243_v18  ;;  %s111_s2 = smov 12  ;;  %s304_s3 = smov 80   ;;  %v247_v23 = vld [vmem:[%s440_s0 + $0x7] ss:$16 sm:%s108_s30]  }
   0xf   :  { %v246_v22 = vld [vmem:[%s440_s0 + $0x8] ss:$16 sm:%s99_s27]   ;;  %79 = vrot.lane.b32.xlu1 %v78_v17, %s304_s3  ;;  %s120_s6 = smov 3  ;;  %s123_s11 = smov 12  ;;  %vm117_vm10 = vcmask 523712   ;;  %vm129_vm11 = vcmask 458112  }
  0x10   :  { %v102_v24 = vsel %vm7_vm0, %v246_v22, %v245_v20  ;;  %v248_v25 = vld [vmem:[%s440_s0 + $0x7] ss:$16 sm:%s111_s2]   ;;  %v249_v26 = vld [vmem:[%s440_s0 + $0x6] ss:$16 sm:%s120_s6]   ;;  %s305_s12 = smov 72   ;;  %s132_s15 = smov 3 }
  0x11   :  { %91 = vrot.lane.b32.xlu0 %v90_v21, %s305_s12  ;;  %v250_v27 = vld [vmem:[%s440_s0 + $0x6] ss:$16 sm:%s123_s11]   ;;  %s135_s16 = smov 12  ;;  %v114_v28 = vsel %vm7_vm0, %v248_v25, %v247_v23  ;;  %s144_s19 = smov 3  ;;  %vm141_vm12 = vcmask 392512   ;;  %vm153_vm13 = vcmask 326912  }
  0x12   :  { %v251_v29 = vld [vmem:[%s440_s0 + $0x5] ss:$16 sm:%s132_s15]   ;;  %s306_s20 = smov 64   ;;  %s147_s23 = smov 12  ;;  %v126_v31 = vsel %vm7_vm0, %v250_v27, %v249_v26  ;;  %v253_v32 = vld [vmem:[%s440_s0 + $0x4] ss:$16 sm:%s144_s19]  }
  0x13   :  { %103 = vrot.lane.b32.xlu1 %v102_v24, %s306_s20  ;;  %v252_v30 = vld [vmem:[%s440_s0 + $0x5] ss:$16 sm:%s135_s16]   ;;  %s156_s26 = smov 3  ;;  %s159_s27 = smov 12  ;;  %vm165_vm14 = vcmask 261312   ;;  %vm177_vm15 = vcmask 195712  }
  0x14   :  { %s307_s28 = smov 56   ;;  %v254_v33 = vld [vmem:[%s440_s0 + $0x4] ss:$16 sm:%s147_s23]   ;;  %s168_s2 = smov 3  ;;  %v138_v34 = vsel %vm7_vm0, %v252_v30, %v251_v29  ;;  %v255_v35 = vld [vmem:[%s440_s0 + $0x3] ss:$16 sm:%s156_s26]  }
  0x15   :  { %115 = vrot.lane.b32.xlu0 %v114_v28, %s307_s28  ;;  %s171_s5 = smov 12  ;;  %s308_s6 = smov 48   ;;  %v256_v36 = vld [vmem:[%s440_s0 + $0x3] ss:$16 sm:%s159_s27]   ;;  %v150_v37 = vsel %vm7_vm0, %v254_v33, %v253_v32 }
  0x16   :  { %s180_s9 = smov 3  ;;  %v257_v38 = vld [vmem:[%s440_s0 + $0x2] ss:$16 sm:%s168_s2]   ;;  %s183_s14 = smov 12  ;;  %v162_v41 = vsel %vm7_vm0, %v256_v36, %v255_v35 }
  0x17   :  { %127 = vrot.lane.b32.xlu1 %v126_v31, %s308_s6  ;;  %v258_v39 = vld [vmem:[%s440_s0 + $0x2] ss:$16 sm:%s171_s5]   ;;  %s3_s15 = smov 3  ;;  %s309_s16 = smov 40  }
  0x18   :  { %v4_v40 = vld [vmem:[%s440_s0] ss:$16 sm:%s3_s15]   ;;  %s5_s19 = smov 12  ;;  %v259_v42 = vld [vmem:[%s440_s0 + $0x1] ss:$16 sm:%s180_s9]   ;;  %s310_s24 = smov 32   ;;  %v174_v46 = vsel %vm7_vm0, %v258_v39, %v257_v38 }
  0x19   :  { %139 = vrot.lane.b32.xlu0 %v138_v34, %s309_s16  ;;  %v6_v43 = vld [vmem:[%s440_s0] ss:$16 sm:%s5_s19]   ;;  %s312_s27 = smov 16   ;;  %s313_s28 = smov 8  }
  0x1a   :  { %v260_v44 = vld [vmem:[%s440_s0 + $0x1] ss:$16 sm:%s183_s14]   ;;  %v8_v45 = vsel %vm7_vm0, %v6_v43, %v4_v40  ;;  %s311_s0 = smov 24   ;;  %s314_s29 = smov [#allocation0]  }
  0x1b   :  { %151 = vrot.lane.b32.xlu1 %v150_v37, %s310_s24  ;;  %10 = vst.msk [vmem:[#allocation2] ss:$8 sm:$0xf] %vm9_vm1, %v8_v45   ;;  %v186_v47 = vsel %vm7_vm0, %v260_v44, %v259_v42  ;;  %vm189_vm0 = vcmask 130112   ;;  %s223_s30 = sshll.u32 %s314_s29, 4  ;;  %s224_s30 = int_to_ptr.vmem [resolvable:$true] %s223_s30 }
  0x1c   :  { %s277_s2 = scalar_lea.vmem %s224_s30, 64  ;;  %p282_p1 = scmp.lt.s32.totalorder %s224_s30, %s224_s30 }
  0x1d   :  { %163 = vrot.lane.b32.xlu0 %v162_v41, %s311_s0  ;;  %p278_p0 = scmp.ne.s32.totalorder %s224_s30, %s277_s2  ;;  %p283_p2 = scmp.lt.s32.totalorder %s277_s2, %s277_s2 }
  0x1f   :  { %175 = vrot.lane.b32.xlu1 %v174_v46, %s312_s27  ;;  %p284_p3 = por %p283_p2, %p282_p1 }
  0x21   :  { %187 = vrot.lane.b32.xlu0 %v186_v47, %s313_s28  ;;  %p285_p4 = pnand %p284_p3, %p278_p0 }
  0x76   :  { %v20_v48 = vpop.permute.xlu0 %19  }
  0x77   :  { %22 = vst.msk [vmem:[#allocation2] ss:$8 sm:$0xf] %vm21_vm2, %v20_v48   ;;  %v44_v49 = vpop.permute.xlu1 %43  }
  0x7a   :  { %v32_v50 = vpop.permute.xlu0 %31  }
  0x7b   :  { %34 = vst.msk [vmem:[#allocation2] ss:$8 sm:$0xf] %vm33_vm3, %v32_v50  }
  0x7c   :  { %46 = vst.msk [vmem:[#allocation2] ss:$8 sm:$0xf] %vm45_vm4, %v44_v49  }
  0x7d   :  { %v56_v51 = vpop.permute.xlu1 %55  }
  0x7e   :  { %58 = vst.msk [vmem:[#allocation2] ss:$8 sm:$0xf] %vm57_vm5, %v56_v51  }
  0x7f   :  { %v68_v52 = vpop.permute.xlu0 %67  }
  0x80   :  { %70 = vst.msk [vmem:[#allocation2] ss:$8 sm:$0xf] %vm69_vm6, %v68_v52  }
  0x81   :  { %v80_v53 = vpop.permute.xlu1 %79  }
  0x82   :  { %82 = vst.msk [vmem:[#allocation2] ss:$8 sm:$0xf] %vm81_vm7, %v80_v53  }
  0x83   :  { %v92_v54 = vpop.permute.xlu0 %91  }
  0x84   :  { %94 = vst.msk [vmem:[#allocation2] ss:$8 sm:$0xf] %vm93_vm8, %v92_v54  }
  0x85   :  { %v104_v55 = vpop.permute.xlu1 %103  }
  0x86   :  { %106 = vst.msk [vmem:[#allocation2] ss:$8 sm:$0xf] %vm105_vm9, %v104_v55  }
  0x87   :  { %v116_v56 = vpop.permute.xlu0 %115  }
  0x88   :  { %118 = vst.msk [vmem:[#allocation2] ss:$8 sm:$0xf] %vm117_vm10, %v116_v56  }
  0x89   :  { %v128_v57 = vpop.permute.xlu1 %127  }
  0x8a   :  { %130 = vst.msk [vmem:[#allocation2] ss:$8 sm:$0xf] %vm129_vm11, %v128_v57  }
  0x8b   :  { %v140_v58 = vpop.permute.xlu0 %139  }
  0x8c   :  { %142 = vst.msk [vmem:[#allocation2] ss:$8 sm:$0xf] %vm141_vm12, %v140_v58  }
  0x8d   :  { %v152_v59 = vpop.permute.xlu1 %151  }
  0x8e   :  { %154 = vst.msk [vmem:[#allocation2] ss:$8 sm:$0xf] %vm153_vm13, %v152_v59  }
  0x8f   :  { %v164_v60 = vpop.permute.xlu0 %163  }
  0x90   :  { %166 = vst.msk [vmem:[#allocation2] ss:$8 sm:$0xf] %vm165_vm14, %v164_v60  }
  0x91   :  { %v176_v61 = vpop.permute.xlu1 %175  }
  0x92   :  { %178 = vst.msk [vmem:[#allocation2] ss:$8 sm:$0xf] %vm177_vm15, %v176_v61  }
  0x93   :  { %v188_v62 = vpop.permute.xlu0 %187  }
  0x94   :  { %190 = vst.msk [vmem:[#allocation2] ss:$8 sm:$0xf] %vm189_vm0, %v188_v62  }
  0x9b   :  { %v195_v63 = vld [vmem:[#allocation2] sm:$0x1]  ;;  %v200_v0 = vld [vmem:[#allocation2 + $0x8] sm:$0x1]  ;;  %v206_v1 = vld [vmem:[#allocation2 + $0x10] sm:$0x1] }
  0x9c   :  { %198 = vst [vmem:[#allocation0] sm:$0x1] %v195_v63  ;;  %204 = vst [vmem:[#allocation0 + $0x1] sm:$0x1] %v200_v0  ;;  %v213_v2 = vld [vmem:[#allocation2 + $0x18] sm:$0x1] }
  0x9d   :  { %211 = vst [vmem:[#allocation0 + $0x2] sm:$0x1] %v206_v1  ;;  %218 = vst [vmem:[#allocation0 + $0x3] sm:$0x1] %v213_v2 }
  0x9e   :  { %288 = shalt.err (!%p285_p4)
}
  0x9f   :  { %226 = dma.vmem_to_hbm [thread:$0]  %s224_s30, 64, %s441_s1, [#allocation1]  }
  0xa0   :  { %297 = dma.done.wait [#allocation1], 64  }
  0xa1   :  { %298 = vsyncadd [#allocation1], 4294967232 }
  0xa2   :  { %228 = vsyncpa [#allocation1], 1 }

// kernel: deconv_block.1
= control target key start
LH: loop header
LB: loop body
LE: loop exit
PB: predicated region body
PF: predicated region fallthrough
CT: control target
= control target key end

     0   :  { %vm374_vm0 = vcmask 1043456   ;;  %vm367_vm1 = vcmask 719872   ;;  %s4365_s1 = inlined_call_operand.vmem [shape: bf16[216,512], index: 1, kind: input, shape index: {}]   ;;  %s4366_s0 = inlined_call_operand.vmem [shape: bf16[32,216], index: 0, kind: input, shape index: {}]   ;;  %s4367_s2 = inlined_call_operand.vmem [shape: f32[512,512], index: 2, kind: input, shape index: {}]   ;;  %s4368_s3 = inlined_call_operand.vmem [shape: f32[1,512], index: 3, kind: input, shape index: {}]   ;;  %s4369_s4 = inlined_call_operand.vmem [shape: f32[1,512], index: 4, kind: input, shape index: {}]   ;;  %s4370_s5 = inlined_call_operand.vmem [shape: f32[32,512], index: 5, kind: output, shape index: {}]  }
   0x1   :  { %v1886_v0 = vld [vmem:[%s4365_s1 + $0xe4] ss:$16 sps:$4 sm:$0xff]   ;;  %v1888_v1 = vld [vmem:[%s4365_s1 + $0xec] ss:$16 sps:$4 sm:$0xff]   ;;  %v1890_v2 = vld [vmem:[%s4365_s1 + $0xe0] ss:$16 sps:$4 sm:$0xff]  }
   0x2   :  { %387 = vmatprep.subr.bf16.mxu0 %v1886_v0  ;;  %v1891_v3 = vld [vmem:[%s4365_s1 + $0xe8] ss:$16 sps:$4 sm:$0xff]   ;;  %440 = vmatprep.subr.bf16.mxu1 %v1888_v1  ;;  %v1892_v4 = vld [vmem:[%s4365_s1 + $0xc4] ss:$16 sps:$4 sm:$0xff]   ;;  %v1894_v5 = vld [vmem:[%s4365_s1 + $0xcc] ss:$16 sps:$4 sm:$0xff]  }
   0x3   :  { %388 = vmatpush1.bf16.msra.mxu0 %v1890_v2  ;;  %441 = vmatpush1.bf16.msra.mxu1 %v1891_v3  ;;  %v1896_v6 = vld [vmem:[%s4365_s1 + $0xc0] ss:$16 sps:$4 sm:$0xff]   ;;  %v1897_v7 = vld [vmem:[%s4365_s1 + $0xc8] ss:$16 sps:$4 sm:$0xff]   ;;  %v1898_v8 = vld [vmem:[%s4365_s1 + $0xa4] ss:$16 sps:$4 sm:$0xff]  }
   0x4   :  { %389 = vmatprep.subr.bf16.mxu0 %v1892_v4  ;;  %442 = vmatprep.subr.bf16.mxu1 %v1894_v5  ;;  %v1900_v9 = vld [vmem:[%s4365_s1 + $0xac] ss:$16 sps:$4 sm:$0xff]   ;;  %v1902_v10 = vld [vmem:[%s4365_s1 + $0xa0] ss:$16 sps:$4 sm:$0xff]   ;;  %v1903_v11 = vld [vmem:[%s4365_s1 + $0xa8] ss:$16 sps:$4 sm:$0xff]  }
   0x5   :  { %v1904_v12 = vld [vmem:[%s4365_s1 + $0x84] ss:$16 sps:$4 sm:$0xff]   ;;  %v1906_v13 = vld [vmem:[%s4365_s1 + $0x8c] ss:$16 sps:$4 sm:$0xff]   ;;  %v1908_v14 = vld [vmem:[%s4365_s1 + $0x80] ss:$16 sps:$4 sm:$0xff]  }
   0x6   :  { %v1909_v15 = vld [vmem:[%s4365_s1 + $0x88] ss:$16 sps:$4 sm:$0xff]   ;;  %v1910_v16 = vld [vmem:[%s4365_s1 + $0x64] ss:$16 sps:$4 sm:$0xff]   ;;  %v1912_v17 = vld [vmem:[%s4365_s1 + $0x6c] ss:$16 sps:$4 sm:$0xff]  }
   0x7   :  { %390 = vmatpush1.bf16.msra.mxu0 %v1896_v6  ;;  %443 = vmatpush1.bf16.msra.mxu1 %v1897_v7  ;;  %v1914_v18 = vld [vmem:[%s4365_s1 + $0x60] ss:$16 sps:$4 sm:$0xff]   ;;  %v1915_v19 = vld [vmem:[%s4365_s1 + $0x68] ss:$16 sps:$4 sm:$0xff]   ;;  %v1916_v20 = vld [vmem:[%s4365_s1 + $0x44] ss:$16 sps:$4 sm:$0xff]  }
   0x8   :  { %391 = vmatprep.subr.bf16.mxu0 %v1898_v8  ;;  %444 = vmatprep.subr.bf16.mxu1 %v1900_v9  ;;  %v1918_v21 = vld [vmem:[%s4365_s1 + $0x4c] ss:$16 sps:$4 sm:$0xff]   ;;  %v1920_v22 = vld [vmem:[%s4365_s1 + $0x40] ss:$16 sps:$4 sm:$0xff]   ;;  %v1921_v23 = vld [vmem:[%s4365_s1 + $0x48] ss:$16 sps:$4 sm:$0xff]  }
   0x9   :  { %v1922_v24 = vld [vmem:[%s4365_s1 + $0x24] ss:$16 sps:$4 sm:$0xff]   ;;  %v1924_v25 = vld [vmem:[%s4365_s1 + $0x2c] ss:$16 sps:$4 sm:$0xff]   ;;  %v1926_v26 = vld [vmem:[%s4365_s1 + $0x20] ss:$16 sps:$4 sm:$0xff]  }
   0xa   :  { %v1927_v27 = vld [vmem:[%s4365_s1 + $0x28] ss:$16 sps:$4 sm:$0xff]   ;;  %v1928_v28 = vld [vmem:[%s4365_s1 + $0x4] ss:$16 sps:$4 sm:$0xff]   ;;  %v1930_v29 = vld [vmem:[%s4365_s1 + $0xc] ss:$16 sps:$4 sm:$0xff]  }
   0xb   :  { %392 = vmatpush1.bf16.msra.mxu0 %v1902_v10  ;;  %445 = vmatpush1.bf16.msra.mxu1 %v1903_v11  ;;  %v77_v30 = vld [vmem:[%s4365_s1 + $0x1a0] sm:$0xff]  ;;  %v78_v31 = vld [vmem:[%s4365_s1 + $0x1a8] sm:$0xff]  ;;  %v1971_v0 = vld [vmem:[%s4366_s0 + $0x14] ss:$8 sps:$4 sm:$0xff]  }
   0xc   :  { %393 = vmatprep.subr.bf16.mxu0 %v1904_v12  ;;  %446 = vmatprep.subr.bf16.mxu1 %v1906_v13  ;;  %v1932_v32 = vld [vmem:[%s4365_s1] ss:$16 sps:$4 sm:$0xff]   ;;  %v1933_v33 = vld [vmem:[%s4365_s1 + $0x8] ss:$16 sps:$4 sm:$0xff]   ;;  %v1860_v34 = vcombine.high %v77_v30, %v77_v30  ;;  %v1862_v35 = vcombine.high %v78_v31, %v78_v31  ;;  %v1859_v36 = vcombine.low %v77_v30, %v77_v30  ;;  %v1938_v38 = vld [vmem:[%s4365_s1 + $0x184] ss:$16 sps:$4 sm:$0xff]  }
   0xd   :  { %v1861_v37 = vcombine.low %v78_v31, %v78_v31  ;;  %v1940_v41 = vld [vmem:[%s4365_s1 + $0x18c] ss:$16 sps:$4 sm:$0xff]   ;;  %v1942_v42 = vld [vmem:[%s4365_s1 + $0x180] ss:$16 sps:$4 sm:$0xff]   ;;  %v1943_v43 = vld [vmem:[%s4365_s1 + $0x188] ss:$16 sps:$4 sm:$0xff]  }
   0xe   :  { %v376_v39 = vsel %vm374_vm0, %v1859_v36, 0  ;;  %v1944_v44 = vld [vmem:[%s4365_s1 + $0x164] ss:$16 sps:$4 sm:$0xff]   ;;  %v1946_v46 = vld [vmem:[%s4365_s1 + $0x16c] ss:$16 sps:$4 sm:$0xff]  }
   0xf   :  { %394 = vmatpush1.bf16.msra.mxu0 %v1908_v14  ;;  %447 = vmatpush1.bf16.msra.mxu1 %v1909_v15  ;;  %v382_v40 = vsel %vm374_vm0, %v1861_v37, 0  ;;  %v1970_v45 = vld [vmem:[%s4366_s0 + $0x4] ss:$8 sps:$4 sm:$0xff]   ;;  %v1948_v47 = vld [vmem:[%s4365_s1 + $0x160] ss:$16 sps:$4 sm:$0xff]  }
  0x10   :  { %395 = vmatprep.subr.bf16.mxu0 %v1910_v16  ;;  %448 = vmatprep.subr.bf16.mxu1 %v1912_v17  ;;  %v1949_v48 = vld [vmem:[%s4365_s1 + $0x168] ss:$16 sps:$4 sm:$0xff]   ;;  %v1950_v49 = vld [vmem:[%s4365_s1 + $0x144] ss:$16 sps:$4 sm:$0xff]   ;;  %v1952_v50 = vld [vmem:[%s4365_s1 + $0x14c] ss:$16 sps:$4 sm:$0xff]  }
  0x11   :  { %1864 = vmatprep.mubr.msk.bf16.mxu0 %vm367_vm1, %v1970_v45  ;;  %1867 = vmatprep.mubr.msk.bf16.mxu1 %vm367_vm1, %v1970_v45  ;;  %v1954_v51 = vld [vmem:[%s4365_s1 + $0x140] ss:$16 sps:$4 sm:$0xff]   ;;  %v1955_v52 = vld [vmem:[%s4365_s1 + $0x148] ss:$16 sps:$4 sm:$0xff]   ;;  %v1956_v53 = vld [vmem:[%s4365_s1 + $0x124] ss:$16 sps:$4 sm:$0xff]  }
  0x12   :  { %v1958_v54 = vld [vmem:[%s4365_s1 + $0x12c] ss:$16 sps:$4 sm:$0xff]   ;;  %v1960_v55 = vld [vmem:[%s4365_s1 + $0x120] ss:$16 sps:$4 sm:$0xff]   ;;  %v1961_v56 = vld [vmem:[%s4365_s1 + $0x128] ss:$16 sps:$4 sm:$0xff]  }
  0x13   :  { %396 = vmatpush1.bf16.msra.mxu0 %v1914_v18  ;;  %449 = vmatpush1.bf16.msra.mxu1 %v1915_v19  ;;  %v1962_v57 = vld [vmem:[%s4365_s1 + $0x104] ss:$16 sps:$4 sm:$0xff]   ;;  %v1964_v58 = vld [vmem:[%s4365_s1 + $0x10c] ss:$16 sps:$4 sm:$0xff]   ;;  %v1966_v59 = vld [vmem:[%s4365_s1 + $0x100] ss:$16 sps:$4 sm:$0xff]  }
  0x14   :  { %397 = vmatprep.subr.bf16.mxu0 %v1916_v20  ;;  %450 = vmatprep.subr.bf16.mxu1 %v1918_v21  ;;  %v1967_v60 = vld [vmem:[%s4365_s1 + $0x108] ss:$16 sps:$4 sm:$0xff]   ;;  %v553_v1 = vld [vmem:[%s4367_s2 + $0x1e0] sm:$0xff] }
  0x15   :  { %v554_v61 = vld [vmem:[%s4367_s2 + $0x1e8] sm:$0xff]  ;;  %v681_v2 = vld [vmem:[%s4367_s2 + $0x5e0] sm:$0xff]  ;;  %v1973_v11 = vld [vmem:[%s4366_s0 + $0x10] ss:$8 sps:$4 sm:$0xff]  }
  0x16   :  { %v682_v62 = vld [vmem:[%s4367_s2 + $0x5e8] sm:$0xff]  ;;  %v549_v5 = vld [vmem:[%s4367_s2 + $0x1c0] sm:$0xff] }
  0x17   :  { %398 = vmatpush1.bf16.msra.mxu0 %v1920_v22  ;;  %451 = vmatpush1.bf16.msra.mxu1 %v1921_v23  ;;  %v1968_v63 = vld [vmem:[%s4366_s0] ss:$8 sps:$4 sm:$0xff]  }
  0x18   :  { %399 = vmatprep.subr.bf16.mxu0 %v1922_v24  ;;  %452 = vmatprep.subr.bf16.mxu1 %v1924_v25  ;;  %v550_v3 = vld [vmem:[%s4367_s2 + $0x1c8] sm:$0xff]  ;;  %v677_v6 = vld [vmem:[%s4367_s2 + $0x5c0] sm:$0xff] }
  0x19   :  { %v678_v4 = vld [vmem:[%s4367_s2 + $0x5c8] sm:$0xff]  ;;  %v545_v9 = vld [vmem:[%s4367_s2 + $0x1a0] sm:$0xff] }
  0x1a   :  { %v546_v7 = vld [vmem:[%s4367_s2 + $0x1a8] sm:$0xff]  ;;  %v673_v10 = vld [vmem:[%s4367_s2 + $0x5a0] sm:$0xff] }
  0x1b   :  { %400 = vmatpush1.bf16.msra.mxu0 %v1926_v26  ;;  %453 = vmatpush1.bf16.msra.mxu1 %v1927_v27  ;;  %v674_v8 = vld [vmem:[%s4367_s2 + $0x5a8] sm:$0xff]  ;;  %v541_v14 = vld [vmem:[%s4367_s2 + $0x180] sm:$0xff] }
  0x1c   :  { %401 = vmatprep.subr.bf16.mxu0 %v1928_v28  ;;  %454 = vmatprep.subr.bf16.mxu1 %v1930_v29  ;;  %v542_v12 = vld [vmem:[%s4367_s2 + $0x188] sm:$0xff]  ;;  %v669_v15 = vld [vmem:[%s4367_s2 + $0x580] sm:$0xff] }
  0x1d   :  { %v670_v13 = vld [vmem:[%s4367_s2 + $0x588] sm:$0xff]  ;;  %v537_v18 = vld [vmem:[%s4367_s2 + $0x160] sm:$0xff] }
  0x1e   :  { %v538_v16 = vld [vmem:[%s4367_s2 + $0x168] sm:$0xff]  ;;  %v665_v19 = vld [vmem:[%s4367_s2 + $0x560] sm:$0xff] }
  0x1f   :  { %402 = vmatpush1.bf16.msra.mxu0 %v1932_v32  ;;  %455 = vmatpush1.bf16.msra.mxu1 %v1933_v33  ;;  %v666_v17 = vld [vmem:[%s4367_s2 + $0x568] sm:$0xff]  ;;  %v533_v22 = vld [vmem:[%s4367_s2 + $0x140] sm:$0xff] }
  0x20   :  { %1863 = vmatprep.subr.msk.bf16.mxu0 %vm374_vm0, %v1860_v34  ;;  %1866 = vmatprep.subr.msk.bf16.mxu1 %vm374_vm0, %v1862_v35  ;;  %v534_v20 = vld [vmem:[%s4367_s2 + $0x148] sm:$0xff]  ;;  %v661_v23 = vld [vmem:[%s4367_s2 + $0x540] sm:$0xff] }
  0x21   :  { %v662_v21 = vld [vmem:[%s4367_s2 + $0x548] sm:$0xff]  ;;  %v529_v26 = vld [vmem:[%s4367_s2 + $0x120] sm:$0xff] }
  0x22   :  { %v530_v24 = vld [vmem:[%s4367_s2 + $0x128] sm:$0xff]  ;;  %v657_v27 = vld [vmem:[%s4367_s2 + $0x520] sm:$0xff] }
  0x23   :  { %408 = vmatpush2.bf16.msra.mxu0 %v376_v39  ;;  %461 = vmatpush2.bf16.msra.mxu1 %v382_v40  ;;  %v658_v25 = vld [vmem:[%s4367_s2 + $0x528] sm:$0xff]  ;;  %v525_v30 = vld [vmem:[%s4367_s2 + $0x100] sm:$0xff] }
  0x24   :  { %409 = vmatprep.subr.bf16.mxu0 %v1938_v38  ;;  %462 = vmatprep.subr.bf16.mxu1 %v1940_v41  ;;  %v526_v28 = vld [vmem:[%s4367_s2 + $0x108] sm:$0xff]  ;;  %v653_v31 = vld [vmem:[%s4367_s2 + $0x500] sm:$0xff] }
  0x25   :  { %v654_v29 = vld [vmem:[%s4367_s2 + $0x508] sm:$0xff]  ;;  %v521_v34 = vld [vmem:[%s4367_s2 + $0xe0] sm:$0xff] }
  0x26   :  { %v522_v32 = vld [vmem:[%s4367_s2 + $0xe8] sm:$0xff]  ;;  %v649_v35 = vld [vmem:[%s4367_s2 + $0x4e0] sm:$0xff] }
  0x27   :  { %410 = vmatpush2.bf16.msra.mxu0 %v1942_v42  ;;  %463 = vmatpush2.bf16.msra.mxu1 %v1943_v43  ;;  %v650_v33 = vld [vmem:[%s4367_s2 + $0x4e8] sm:$0xff]  ;;  %v517_v38 = vld [vmem:[%s4367_s2 + $0xc0] sm:$0xff] }
  0x28   :  { %411 = vmatprep.subr.bf16.mxu0 %v1944_v44  ;;  %464 = vmatprep.subr.bf16.mxu1 %v1946_v46  ;;  %v518_v36 = vld [vmem:[%s4367_s2 + $0xc8] sm:$0xff]  ;;  %v645_v39 = vld [vmem:[%s4367_s2 + $0x4c0] sm:$0xff] }
  0x29   :  { %v646_v37 = vld [vmem:[%s4367_s2 + $0x4c8] sm:$0xff]  ;;  %v513_v42 = vld [vmem:[%s4367_s2 + $0xa0] sm:$0xff] }
  0x2a   :  { %v514_v40 = vld [vmem:[%s4367_s2 + $0xa8] sm:$0xff]  ;;  %v641_v43 = vld [vmem:[%s4367_s2 + $0x4a0] sm:$0xff] }
  0x2b   :  { %412 = vmatpush2.bf16.msra.mxu0 %v1948_v47  ;;  %465 = vmatpush2.bf16.msra.mxu1 %v1949_v48  ;;  %v642_v41 = vld [vmem:[%s4367_s2 + $0x4a8] sm:$0xff]  ;;  %v509_v46 = vld [vmem:[%s4367_s2 + $0x80] sm:$0xff] }
  0x2c   :  { %413 = vmatprep.subr.bf16.mxu0 %v1950_v49  ;;  %466 = vmatprep.subr.bf16.mxu1 %v1952_v50  ;;  %v510_v44 = vld [vmem:[%s4367_s2 + $0x88] sm:$0xff]  ;;  %v637_v47 = vld [vmem:[%s4367_s2 + $0x480] sm:$0xff] }
  0x2d   :  { %v638_v45 = vld [vmem:[%s4367_s2 + $0x488] sm:$0xff]  ;;  %v505_v50 = vld [vmem:[%s4367_s2 + $0x60] sm:$0xff] }
  0x2e   :  { %v506_v48 = vld [vmem:[%s4367_s2 + $0x68] sm:$0xff] }
  0x2f   :  { %414 = vmatpush2.bf16.msra.mxu0 %v1954_v51  ;;  %467 = vmatpush2.bf16.msra.mxu1 %v1955_v52  ;;  %v634_v49 = vld [vmem:[%s4367_s2 + $0x468] sm:$0xff]  ;;  %v633_v51 = vld [vmem:[%s4367_s2 + $0x460] sm:$0xff] }
  0x30   :  { %415 = vmatprep.subr.bf16.mxu0 %v1956_v53  ;;  %468 = vmatprep.subr.bf16.mxu1 %v1958_v54  ;;  %v502_v52 = vld [vmem:[%s4367_s2 + $0x48] sm:$0xff]  ;;  %v2474_v54 = vld [vmem:[%s4367_s2 + $0x40] sm:$0xff] }
  0x31   :  { %v630_v53 = vld [vmem:[%s4367_s2 + $0x448] sm:$0xff] }
  0x33   :  { %416 = vmatpush2.bf16.msra.mxu0 %v1960_v55  ;;  %469 = vmatpush2.bf16.msra.mxu1 %v1961_v56  ;;  %v2479_v55 = vld [vmem:[%s4367_s2 + $0x440] sm:$0xff]  ;;  %v2484_v56 = vld [vmem:[%s4367_s2 + $0x28] sm:$0xff] }
  0x34   :  { %417 = vmatprep.subr.bf16.mxu0 %v1962_v57  ;;  %470 = vmatprep.subr.bf16.mxu1 %v1964_v58  ;;  %v2489_v57 = vld [vmem:[%s4367_s2 + $0x428] sm:$0xff]  ;;  %v2494_v58 = vld [vmem:[%s4367_s2 + $0x20] sm:$0xff] }
  0x37   :  { %418 = vmatpush2.bf16.msra.mxu0 %v1966_v59  ;;  %471 = vmatpush2.bf16.msra.mxu1 %v1967_v60  ;;  %v2499_v59 = vld [vmem:[%s4367_s2 + $0x420] sm:$0xff]  ;;  %v2506_v60 = vld [vmem:[%s4367_s2 + $0x8] sm:$0xff] }
  0x38   :  { %749 = vmatprep.subr.mxu0 %v554_v61  ;;  %838 = vmatprep.subr.mxu1 %v682_v62  ;;  %v2511_v61 = vld [vmem:[%s4367_s2 + $0x408] sm:$0xff]  ;;  %v2518_v62 = vld [vmem:[%s4367_s2] sm:$0xff] }
  0x3a   :  { %420 = vmatmul.mubr.bf16.vlgmr.msra.gmra.mxu0 %v1968_v63  ;;  %473 = vmatmul.mubr.bf16.vlgmr.msra.gmra.mxu1 %v1968_v63  ;;  %v2523_v63 = vld [vmem:[%s4367_s2 + $0x400] sm:$0xff] }
  0x3b   :  { %1865 = vmatprep.mubr.msk.bf16.mxu0 %vm367_vm1, %v1971_v0  ;;  %1868 = vmatprep.mubr.msk.bf16.mxu1 %vm367_vm1, %v1971_v0  ;;  %v2530_v0 = vld [vmem:[%s4367_s2 + $0x3e8] sm:$0xff] }
  0x3c   :  { %750 = vmatpush1.msra.mxu0 %v553_v1  ;;  %839 = vmatpush1.msra.mxu1 %v681_v2  ;;  %v2535_v1 = vld [vmem:[%s4367_s2 + $0x7e8] sm:$0xff]  ;;  %v2542_v2 = vld [vmem:[%s4367_s2 + $0x3e0] sm:$0xff] }
  0x3d   :  { %751 = vmatprep.subr.mxu0 %v550_v3  ;;  %840 = vmatprep.subr.mxu1 %v678_v4  ;;  %v2547_v3 = vld [vmem:[%s4367_s2 + $0x7e0] sm:$0xff]  ;;  %v2554_v4 = vld [vmem:[%s4367_s2 + $0x3c8] sm:$0xff] }
  0x3e   :  { %752 = vmatpush1.msra.mxu0 %v549_v5  ;;  %841 = vmatpush1.msra.mxu1 %v677_v6  ;;  %v2559_v5 = vld [vmem:[%s4367_s2 + $0x7c8] sm:$0xff]  ;;  %v2566_v6 = vld [vmem:[%s4367_s2 + $0x3c0] sm:$0xff] }
  0x3f   :  { %753 = vmatprep.subr.mxu0 %v546_v7  ;;  %842 = vmatprep.subr.mxu1 %v674_v8  ;;  %v2571_v7 = vld [vmem:[%s4367_s2 + $0x7c0] sm:$0xff]  ;;  %v2578_v8 = vld [vmem:[%s4367_s2 + $0x3a8] sm:$0xff] }
  0x40   :  { %754 = vmatpush1.msra.mxu0 %v545_v9  ;;  %843 = vmatpush1.msra.mxu1 %v673_v10  ;;  %v2583_v9 = vld [vmem:[%s4367_s2 + $0x7a8] sm:$0xff]  ;;  %v2590_v10 = vld [vmem:[%s4367_s2 + $0x3a0] sm:$0xff] }
  0x41   :  { %755 = vmatprep.subr.mxu0 %v542_v12  ;;  %844 = vmatprep.subr.mxu1 %v670_v13  ;;  %v2602_v12 = vld [vmem:[%s4367_s2 + $0x388] sm:$0xff] }
  0x42   :  { %430 = vmatmul.mubr.bf16.gmra.mxu0 %v1973_v11  ;;  %483 = vmatmul.mubr.bf16.gmra.mxu1 %v1973_v11  ;;  %v2595_v11 = vld [vmem:[%s4367_s2 + $0x7a0] sm:$0xff]  ;;  %v2607_v13 = vld [vmem:[%s4367_s2 + $0x788] sm:$0xff] }
  0x43   :  { %756 = vmatpush1.msra.mxu0 %v541_v14  ;;  %845 = vmatpush1.msra.mxu1 %v669_v15  ;;  %v2614_v14 = vld [vmem:[%s4367_s2 + $0x380] sm:$0xff] }
  0x44   :  { %757 = vmatprep.subr.mxu0 %v538_v16  ;;  %846 = vmatprep.subr.mxu1 %v666_v17  ;;  %v2619_v15 = vld [vmem:[%s4367_s2 + $0x780] sm:$0xff]  ;;  %v2626_v16 = vld [vmem:[%s4367_s2 + $0x368] sm:$0xff] }
  0x45   :  { %758 = vmatpush1.msra.mxu0 %v537_v18  ;;  %847 = vmatpush1.msra.mxu1 %v665_v19  ;;  %v2631_v17 = vld [vmem:[%s4367_s2 + $0x768] sm:$0xff]  ;;  %v2638_v18 = vld [vmem:[%s4367_s2 + $0x360] sm:$0xff] }
  0x46   :  { %759 = vmatprep.subr.mxu0 %v534_v20  ;;  %848 = vmatprep.subr.mxu1 %v662_v21  ;;  %v2643_v19 = vld [vmem:[%s4367_s2 + $0x760] sm:$0xff]  ;;  %v2650_v20 = vld [vmem:[%s4367_s2 + $0x348] sm:$0xff] }
  0x47   :  { %760 = vmatpush1.msra.mxu0 %v533_v22  ;;  %849 = vmatpush1.msra.mxu1 %v661_v23  ;;  %v2655_v21 = vld [vmem:[%s4367_s2 + $0x748] sm:$0xff]  ;;  %v2662_v22 = vld [vmem:[%s4367_s2 + $0x340] sm:$0xff] }
  0x48   :  { %761 = vmatprep.subr.mxu0 %v530_v24  ;;  %850 = vmatprep.subr.mxu1 %v658_v25  ;;  %v2667_v23 = vld [vmem:[%s4367_s2 + $0x740] sm:$0xff]  ;;  %v2674_v24 = vld [vmem:[%s4367_s2 + $0x328] sm:$0xff] }
  0x49   :  { %762 = vmatpush1.msra.mxu0 %v529_v26  ;;  %851 = vmatpush1.msra.mxu1 %v657_v27  ;;  %v2679_v25 = vld [vmem:[%s4367_s2 + $0x728] sm:$0xff]  ;;  %v2686_v26 = vld [vmem:[%s4367_s2 + $0x320] sm:$0xff] }
  0x4a   :  { %763 = vmatprep.subr.mxu0 %v526_v28  ;;  %852 = vmatprep.subr.mxu1 %v654_v29  ;;  %v2691_v27 = vld [vmem:[%s4367_s2 + $0x720] sm:$0xff]  ;;  %v2698_v28 = vld [vmem:[%s4367_s2 + $0x308] sm:$0xff] }
  0x4b   :  { %764 = vmatpush1.msra.mxu0 %v525_v30  ;;  %853 = vmatpush1.msra.mxu1 %v653_v31  ;;  %v2703_v29 = vld [vmem:[%s4367_s2 + $0x708] sm:$0xff]  ;;  %v2710_v30 = vld [vmem:[%s4367_s2 + $0x300] sm:$0xff] }
  0x4c   :  { %765 = vmatprep.subr.mxu0 %v522_v32  ;;  %854 = vmatprep.subr.mxu1 %v650_v33  ;;  %4498 = vst [vmem:[#allocation2_spill] sm:$0xff] %v2710_v30  ;;  %v2715_v31 = vld [vmem:[%s4367_s2 + $0x700] sm:$0xff]  ;;  %v2722_v32 = vld [vmem:[%s4367_s2 + $0x2e8] sm:$0xff] }
  0x4d   :  { %766 = vmatpush1.msra.mxu0 %v521_v34  ;;  %855 = vmatpush1.msra.mxu1 %v649_v35  ;;  %4499 = vst [vmem:[#allocation3_spill] sm:$0xff] %v2715_v31  ;;  %4500 = vst [vmem:[#allocation4_spill] sm:$0xff] %v2722_v32  ;;  %v2727_v33 = vld [vmem:[%s4367_s2 + $0x6e8] sm:$0xff]  ;;  %v2734_v34 = vld [vmem:[%s4367_s2 + $0x2e0] sm:$0xff] }
  0x4e   :  { %767 = vmatprep.subr.mxu0 %v518_v36  ;;  %856 = vmatprep.subr.mxu1 %v646_v37  ;;  %4501 = vst [vmem:[#allocation5_spill] sm:$0xff] %v2727_v33  ;;  %4502 = vst [vmem:[#allocation6_spill] sm:$0xff] %v2734_v34  ;;  %v2739_v35 = vld [vmem:[%s4367_s2 + $0x6e0] sm:$0xff]  ;;  %v2746_v36 = vld [vmem:[%s4367_s2 + $0x2c8] sm:$0xff] }
  0x4f   :  { %768 = vmatpush1.msra.mxu0 %v517_v38  ;;  %857 = vmatpush1.msra.mxu1 %v645_v39  ;;  %4503 = vst [vmem:[#allocation7_spill] sm:$0xff] %v2739_v35  ;;  %4504 = vst [vmem:[#allocation8_spill] sm:$0xff] %v2746_v36  ;;  %v2751_v37 = vld [vmem:[%s4367_s2 + $0x6c8] sm:$0xff]  ;;  %v2758_v38 = vld [vmem:[%s4367_s2 + $0x2c0] sm:$0xff] }
  0x50   :  { %769 = vmatprep.subr.mxu0 %v514_v40  ;;  %858 = vmatprep.subr.mxu1 %v642_v41  ;;  %4505 = vst [vmem:[#allocation9_spill] sm:$0xff] %v2751_v37  ;;  %4506 = vst [vmem:[#allocation10_spill] sm:$0xff] %v2758_v38  ;;  %v2763_v39 = vld [vmem:[%s4367_s2 + $0x6c0] sm:$0xff]  ;;  %v2770_v40 = vld [vmem:[%s4367_s2 + $0x2a8] sm:$0xff] }
  0x51   :  { %770 = vmatpush1.msra.mxu0 %v513_v42  ;;  %859 = vmatpush1.msra.mxu1 %v641_v43  ;;  %4507 = vst [vmem:[#allocation11_spill] sm:$0xff] %v2763_v39  ;;  %4508 = vst [vmem:[#allocation12_spill] sm:$0xff] %v2770_v40  ;;  %v2775_v41 = vld [vmem:[%s4367_s2 + $0x6a8] sm:$0xff]  ;;  %v2782_v42 = vld [vmem:[%s4367_s2 + $0x2a0] sm:$0xff] }
  0x52   :  { %771 = vmatprep.subr.mxu0 %v510_v44  ;;  %860 = vmatprep.subr.mxu1 %v638_v45  ;;  %4509 = vst [vmem:[#allocation13_spill] sm:$0xff] %v2775_v41  ;;  %4510 = vst [vmem:[#allocation14_spill] sm:$0xff] %v2782_v42  ;;  %v2787_v43 = vld [vmem:[%s4367_s2 + $0x6a0] sm:$0xff]  ;;  %v2794_v44 = vld [vmem:[%s4367_s2 + $0x288] sm:$0xff] }
  0x53   :  { %772 = vmatpush1.msra.mxu0 %v509_v46  ;;  %861 = vmatpush1.msra.mxu1 %v637_v47  ;;  %4511 = vst [vmem:[#allocation15_spill] sm:$0xff] %v2787_v43  ;;  %4512 = vst [vmem:[#allocation16_spill] sm:$0xff] %v2794_v44  ;;  %v2799_v45 = vld [vmem:[%s4367_s2 + $0x688] sm:$0xff]  ;;  %v2806_v46 = vld [vmem:[%s4367_s2 + $0x280] sm:$0xff] }
  0x54   :  { %773 = vmatprep.subr.mxu0 %v506_v48  ;;  %862 = vmatprep.subr.mxu1 %v634_v49  ;;  %4513 = vst [vmem:[#allocation17_spill] sm:$0xff] %v2799_v45  ;;  %4514 = vst [vmem:[#allocation18_spill] sm:$0xff] %v2806_v46  ;;  %v2811_v47 = vld [vmem:[%s4367_s2 + $0x680] sm:$0xff]  ;;  %v2818_v48 = vld [vmem:[%s4367_s2 + $0x268] sm:$0xff] }
  0x55   :  { %774 = vmatpush1.msra.mxu0 %v505_v50  ;;  %863 = vmatpush1.msra.mxu1 %v633_v51  ;;  %4515 = vst [vmem:[#allocation19_spill] sm:$0xff] %v2811_v47  ;;  %4516 = vst [vmem:[#allocation20_spill] sm:$0xff] %v2818_v48  ;;  %v2823_v49 = vld [vmem:[%s4367_s2 + $0x668] sm:$0xff]  ;;  %v2830_v50 = vld [vmem:[%s4367_s2 + $0x260] sm:$0xff] }
  0x56   :  { %775 = vmatprep.subr.mxu0 %v502_v52  ;;  %864 = vmatprep.subr.mxu1 %v630_v53  ;;  %4517 = vst [vmem:[#allocation21_spill] sm:$0xff] %v2823_v49  ;;  %4518 = vst [vmem:[#allocation22_spill] sm:$0xff] %v2830_v50  ;;  %v2835_v51 = vld [vmem:[%s4367_s2 + $0x660] sm:$0xff]  ;;  %v2842_v52 = vld [vmem:[%s4367_s2 + $0x248] sm:$0xff] }
  0x57   :  { %776 = vmatpush1.msra.mxu0 %v2474_v54  ;;  %865 = vmatpush1.msra.mxu1 %v2479_v55  ;;  %4519 = vst [vmem:[#allocation23_spill] sm:$0xff] %v2835_v51  ;;  %4520 = vst [vmem:[#allocation24_spill] sm:$0xff] %v2842_v52  ;;  %v2847_v53 = vld [vmem:[%s4367_s2 + $0x648] sm:$0xff] }
  0x58   :  { %777 = vmatprep.subr.mxu0 %v2484_v56  ;;  %866 = vmatprep.subr.mxu1 %v2489_v57  ;;  %4521 = vst [vmem:[#allocation25_spill] sm:$0xff] %v2847_v53 }
  0x59   :  { %778 = vmatpush1.msra.mxu0 %v2494_v58  ;;  %867 = vmatpush1.msra.mxu1 %v2499_v59 }
  0x5a   :  { %779 = vmatprep.subr.mxu0 %v2506_v60  ;;  %868 = vmatprep.subr.mxu1 %v2511_v61 }
  0x5b   :  { %780 = vmatpush1.msra.mxu0 %v2518_v62  ;;  %869 = vmatpush1.msra.mxu1 %v2523_v63 }
  0x5c   :  { %781 = vmatprep.subr.mxu0 %v2530_v0  ;;  %870 = vmatprep.subr.mxu1 %v2535_v1 }
  0x5d   :  { %782 = vmatpush2.msra.mxu0 %v2542_v2  ;;  %871 = vmatpush2.msra.mxu1 %v2547_v3 }
  0x5e   :  { %783 = vmatprep.subr.mxu0 %v2554_v4  ;;  %872 = vmatprep.subr.mxu1 %v2559_v5 }
  0x5f   :  { %784 = vmatpush2.msra.mxu0 %v2566_v6  ;;  %873 = vmatpush2.msra.mxu1 %v2571_v7 }
  0x60   :  { %785 = vmatprep.subr.mxu0 %v2578_v8  ;;  %874 = vmatprep.subr.mxu1 %v2583_v9 }
  0x61   :  { %786 = vmatpush2.msra.mxu0 %v2590_v10  ;;  %875 = vmatpush2.msra.mxu1 %v2595_v11 }
  0x62   :  { %787 = vmatprep.subr.mxu0 %v2602_v12  ;;  %876 = vmatprep.subr.mxu1 %v2607_v13 }
  0x63   :  { %788 = vmatpush2.msra.mxu0 %v2614_v14  ;;  %877 = vmatpush2.msra.mxu1 %v2619_v15 }
  0x64   :  { %789 = vmatprep.subr.mxu0 %v2626_v16  ;;  %878 = vmatprep.subr.mxu1 %v2631_v17 }
  0x65   :  { %790 = vmatpush2.msra.mxu0 %v2638_v18  ;;  %879 = vmatpush2.msra.mxu1 %v2643_v19 }
  0x66   :  { %791 = vmatprep.subr.mxu0 %v2650_v20  ;;  %880 = vmatprep.subr.mxu1 %v2655_v21 }
  0x67   :  { %792 = vmatpush2.msra.mxu0 %v2662_v22  ;;  %881 = vmatpush2.msra.mxu1 %v2667_v23 }
  0x68   :  { %793 = vmatprep.subr.mxu0 %v2674_v24  ;;  %882 = vmatprep.subr.mxu1 %v2679_v25 }
  0x69   :  { %794 = vmatpush2.msra.mxu0 %v2686_v26  ;;  %883 = vmatpush2.msra.mxu1 %v2691_v27 }
  0x6a   :  { %795 = vmatprep.subr.mxu0 %v2698_v28  ;;  %884 = vmatprep.subr.mxu1 %v2703_v29 }
  0x6b   :  { %796 = vmatpush2.msra.mxu0 %v2710_v30  ;;  %885 = vmatpush2.msra.mxu1 %v2715_v31  ;;  %v3072_v31 = vld [vmem:[%s4367_s2 + $0x138] sm:$0xff] }
  0x6c   :  { %797 = vmatprep.subr.mxu0 %v2722_v32  ;;  %886 = vmatprep.subr.mxu1 %v2727_v33  ;;  %4547 = vst [vmem:[#allocation51_spill] sm:$0xff] %v3072_v31  ;;  %v660_v30 = vld [vmem:[%s4367_s2 + $0x538] sm:$0xff] }
  0x6d   :  { %798 = vmatpush2.msra.mxu0 %v2734_v34  ;;  %887 = vmatpush2.msra.mxu1 %v2739_v35  ;;  %v3024_v35 = vld [vmem:[%s4367_s2 + $0x178] sm:$0xff] }
  0x6e   :  { %799 = vmatprep.subr.mxu0 %v2746_v36  ;;  %888 = vmatprep.subr.mxu1 %v2751_v37  ;;  %4542 = vst [vmem:[#allocation46_spill] sm:$0xff] %v3024_v35  ;;  %v668_v34 = vld [vmem:[%s4367_s2 + $0x578] sm:$0xff] }
  0x6f   :  { %800 = vmatpush2.msra.mxu0 %v2758_v38  ;;  %889 = vmatpush2.msra.mxu1 %v2763_v39  ;;  %v2976_v39 = vld [vmem:[%s4367_s2 + $0x1b8] sm:$0xff] }
  0x70   :  { %801 = vmatprep.subr.mxu0 %v2770_v40  ;;  %890 = vmatprep.subr.mxu1 %v2775_v41  ;;  %4538 = vst [vmem:[#allocation42_spill] sm:$0xff] %v2976_v39  ;;  %v676_v38 = vld [vmem:[%s4367_s2 + $0x5b8] sm:$0xff] }
  0x71   :  { %802 = vmatpush2.msra.mxu0 %v2782_v42  ;;  %891 = vmatpush2.msra.mxu1 %v2787_v43  ;;  %v2962_v43 = vld [vmem:[%s4367_s2 + $0x1d0] sm:$0xff] }
  0x72   :  { %803 = vmatprep.subr.mxu0 %v2794_v44  ;;  %892 = vmatprep.subr.mxu1 %v2799_v45  ;;  %4537 = vst [vmem:[#allocation41_spill] sm:$0xff] %v2962_v43  ;;  %v679_v42 = vld [vmem:[%s4367_s2 + $0x5d0] sm:$0xff] }
  0x73   :  { %804 = vmatpush2.msra.mxu0 %v2806_v46  ;;  %893 = vmatpush2.msra.mxu1 %v2811_v47  ;;  %v2854_v46 = vld [vmem:[%s4367_s2 + $0x240] sm:$0xff] }
  0x74   :  { %805 = vmatprep.subr.mxu0 %v2818_v48  ;;  %894 = vmatprep.subr.mxu1 %v2823_v49  ;;  %4522 = vst [vmem:[#allocation26_spill] sm:$0xff] %v2854_v46  ;;  %v2859_v47 = vld [vmem:[%s4367_s2 + $0x640] sm:$0xff]  ;;  %v2866_v48 = vld [vmem:[%s4367_s2 + $0x228] sm:$0xff] }
  0x75   :  { %4523 = vst [vmem:[#allocation27_spill] sm:$0xff] %v2859_v47  ;;  %806 = vmatpush2.msra.mxu0 %v2830_v50  ;;  %895 = vmatpush2.msra.mxu1 %v2835_v51  ;;  %4524 = vst [vmem:[#allocation28_spill] sm:$0xff] %v2866_v48  ;;  %v2871_v49 = vld [vmem:[%s4367_s2 + $0x628] sm:$0xff]  ;;  %v2882_v51 = vld [vmem:[%s4367_s2 + $0x220] sm:$0xff] }
  0x76   :  { %4525 = vst [vmem:[#allocation29_spill] sm:$0xff] %v2871_v49  ;;  %807 = vmatprep.subr.mxu0 %v2842_v52  ;;  %896 = vmatprep.subr.mxu1 %v2847_v53  ;;  %4526 = vst [vmem:[#allocation30_spill] sm:$0xff] %v2882_v51  ;;  %v2887_v50 = vld [vmem:[%s4367_s2 + $0x620] sm:$0xff]  ;;  %v2938_v53 = vld [vmem:[%s4367_s2 + $0x1f0] sm:$0xff] }
  0x77   :  { %808 = vmatpush2.msra.mxu0 %v2854_v46  ;;  %897 = vmatpush2.msra.mxu1 %v2859_v47  ;;  %4527 = vst [vmem:[#allocation31_spill] sm:$0xff] %v2887_v50  ;;  %4535 = vst [vmem:[#allocation39_spill] sm:$0xff] %v2938_v53  ;;  %v683_v52 = vld [vmem:[%s4367_s2 + $0x5f0] sm:$0xff] }
  0x78   :  { %809 = vmatprep.subr.mxu0 %v2866_v48  ;;  %898 = vmatprep.subr.mxu1 %v2871_v49  ;;  %v2894_v48 = vld [vmem:[%s4367_s2 + $0x208] sm:$0xff] }
  0x79   :  { %810 = vmatpush2.msra.mxu0 %v2882_v51  ;;  %899 = vmatpush2.msra.mxu1 %v2887_v50  ;;  %4528 = vst [vmem:[#allocation32_spill] sm:$0xff] %v2894_v48  ;;  %v2899_v49 = vld [vmem:[%s4367_s2 + $0x608] sm:$0xff]  ;;  %v2906_v51 = vld [vmem:[%s4367_s2 + $0x200] sm:$0xff] }
  0x7a   :  { %4529 = vst [vmem:[#allocation33_spill] sm:$0xff] %v2899_v49  ;;  %811 = vmatprep.subr.mxu0 %v2894_v48  ;;  %900 = vmatprep.subr.mxu1 %v2899_v49  ;;  %4530 = vst [vmem:[#allocation34_spill] sm:$0xff] %v2906_v51  ;;  %v2911_v50 = vld [vmem:[%s4367_s2 + $0x600] sm:$0xff]  ;;  %v2918_v48 = vld [vmem:[%s4367_s2 + $0x1f8] sm:$0xff] }
  0x7b   :  { %4531 = vst [vmem:[#allocation35_spill] sm:$0xff] %v2911_v50  ;;  %812 = vmatpush2.msra.mxu0 %v2906_v51  ;;  %901 = vmatpush2.msra.mxu1 %v2911_v50  ;;  %4532 = vst [vmem:[#allocation36_spill] sm:$0xff] %v2918_v48  ;;  %v2923_v49 = vld [vmem:[%s4367_s2 + $0x5f8] sm:$0xff] }
  0x7c   :  { %4533 = vst [vmem:[#allocation37_spill] sm:$0xff] %v2923_v49  ;;  %927 = vmatprep.subr.mxu0 %v2918_v48  ;;  %1016 = vmatprep.subr.mxu1 %v2923_v49  ;;  %v2948_v49 = vld [vmem:[%s4367_s2 + $0x1d8] sm:$0xff] }
  0x7d   :  { %4536 = vst [vmem:[#allocation40_spill] sm:$0xff] %v2948_v49  ;;  %v680_v48 = vld [vmem:[%s4367_s2 + $0x5d8] sm:$0xff] }
  0xfa   :  { %v2927_v47 = vpop.f32.mrf.mxu0  ;;  %v2929_v46 = vpop.f32.mrf.mxu1 }
  0xfc   :  { %v2931_v51 = vpop.f32.mrf.mxu0  ;;  %v2933_v50 = vpop.f32.mrf.mxu1 }
  0xfd   :  { %4534 = vst [vmem:[#allocation38_spill] sm:$0xff] %v2933_v50  ;;  %813 = vmatprep.mubr.f32.mxu0 %v2931_v51  ;;  %902 = vmatprep.mubr.f32.mxu1 %v2933_v50 }
  0xfe   :  { %v2953_v45 = vpop.f32.mrf.mxu0  ;;  %v2955_v44 = vpop.f32.mrf.mxu1  ;;  %814 = vmatmul.mubr.f32.vlgmr.msra.gmra.mxu0 %v2927_v47  ;;  %903 = vmatmul.mubr.f32.vlgmr.msra.gmra.mxu1 %v2929_v46 }
  0xff   :  { %928 = vmatpush1.msra.mxu0 %v2938_v53  ;;  %1017 = vmatpush1.msra.mxu1 %v683_v52  ;;  %v675_v53 = vld [vmem:[%s4367_s2 + $0x5b0] sm:$0xff] }
 0x100   :  { %929 = vmatprep.subr.mxu0 %v2948_v49  ;;  %1018 = vmatprep.subr.mxu1 %v680_v48  ;;  %v2969_v41 = vpop.f32.mrf.mxu0  ;;  %v2971_v40 = vpop.f32.mrf.mxu1  ;;  %v2991_v49 = vld [vmem:[%s4367_s2 + $0x1b0] sm:$0xff] }
 0x101   :  { %930 = vmatpush1.msra.mxu0 %v2962_v43  ;;  %1019 = vmatpush1.msra.mxu1 %v679_v42  ;;  %4539 = vst [vmem:[#allocation43_spill] sm:$0xff] %v2991_v49  ;;  %v3000_v42 = vld [vmem:[%s4367_s2 + $0x198] sm:$0xff] }
 0x102   :  { %819 = vmatprep.mubr.f32.mxu0 %v2969_v41  ;;  %908 = vmatprep.mubr.f32.mxu1 %v2971_v40  ;;  %v2984_v48 = vpop.f32.mrf.mxu0  ;;  %v2986_v52 = vpop.f32.mrf.mxu1  ;;  %4540 = vst [vmem:[#allocation44_spill] sm:$0xff] %v3000_v42  ;;  %v672_v43 = vld [vmem:[%s4367_s2 + $0x598] sm:$0xff] }
 0x103   :  { %931 = vmatprep.subr.mxu0 %v2976_v39  ;;  %1020 = vmatprep.subr.mxu1 %v676_v38  ;;  %v3014_v38 = vld [vmem:[%s4367_s2 + $0x190] sm:$0xff] }
 0x104   :  { %820 = vmatmul.mubr.f32.gmra.mxu0 %v2953_v45  ;;  %909 = vmatmul.mubr.f32.gmra.mxu1 %v2955_v44  ;;  %v3007_v37 = vpop.f32.mrf.mxu0  ;;  %v3009_v36 = vpop.f32.mrf.mxu1  ;;  %4541 = vst [vmem:[#allocation45_spill] sm:$0xff] %v3014_v38  ;;  %v671_v39 = vld [vmem:[%s4367_s2 + $0x590] sm:$0xff] }
 0x105   :  { %932 = vmatpush1.msra.mxu0 %v2991_v49  ;;  %1021 = vmatpush1.msra.mxu1 %v675_v53  ;;  %v667_v53 = vld [vmem:[%s4367_s2 + $0x570] sm:$0xff] }
 0x106   :  { %933 = vmatprep.subr.mxu0 %v3000_v42  ;;  %1022 = vmatprep.subr.mxu1 %v672_v43  ;;  %v3030_v33 = vpop.f32.mrf.mxu0  ;;  %v3032_v32 = vpop.f32.mrf.mxu1  ;;  %v3039_v43 = vld [vmem:[%s4367_s2 + $0x170] sm:$0xff] }
 0x107   :  { %934 = vmatpush1.msra.mxu0 %v3014_v38  ;;  %1023 = vmatpush1.msra.mxu1 %v671_v39  ;;  %4543 = vst [vmem:[#allocation47_spill] sm:$0xff] %v3032_v32  ;;  %4544 = vst [vmem:[#allocation48_spill] sm:$0xff] %v3039_v43  ;;  %v3048_v39 = vld [vmem:[%s4367_s2 + $0x158] sm:$0xff]  ;;  %v3058_v42 = vld [vmem:[%s4367_s2 + $0x150] sm:$0xff] }
 0x108   :  { %825 = vmatprep.mubr.f32.mxu0 %v3007_v37  ;;  %914 = vmatprep.mubr.f32.mxu1 %v3009_v36  ;;  %4545 = vst [vmem:[#allocation49_spill] sm:$0xff] %v3048_v39  ;;  %v664_v38 = vld [vmem:[%s4367_s2 + $0x558] sm:$0xff]  ;;  %4546 = vst [vmem:[#allocation50_spill] sm:$0xff] %v3058_v42  ;;  %v3066_v49 = vpop.f32.mrf.mxu1 }
 0x109   :  { %935 = vmatprep.subr.mxu0 %v3024_v35  ;;  %1024 = vmatprep.subr.mxu1 %v668_v34  ;;  %v663_v34 = vld [vmem:[%s4367_s2 + $0x550] sm:$0xff]  ;;  %v3064_v35 = vpop.f32.mrf.mxu0 }
 0x10a   :  { %826 = vmatmul.mubr.f32.gmra.mxu0 %v2984_v48  ;;  %915 = vmatmul.mubr.f32.gmra.mxu1 %v2986_v52 }
 0x10b   :  { %936 = vmatpush1.msra.mxu0 %v3039_v43  ;;  %1025 = vmatpush1.msra.mxu1 %v667_v53  ;;  %v659_v53 = vld [vmem:[%s4367_s2 + $0x530] sm:$0xff]  ;;  %v3131_v43 = vld [vmem:[%s4367_s2 + $0xd8] sm:$0xff] }
 0x10c   :  { %937 = vmatprep.subr.mxu0 %v3048_v39  ;;  %1026 = vmatprep.subr.mxu1 %v664_v38  ;;  %v3083_v38 = vld [vmem:[%s4367_s2 + $0x130] sm:$0xff]  ;;  %v3113_v39 = vld [vmem:[%s4367_s2 + $0xf8] sm:$0xff]  ;;  %4553 = vst [vmem:[#allocation57_spill] sm:$0xff] %v3131_v43 }
 0x10d   :  { %938 = vmatpush1.msra.mxu0 %v3058_v42  ;;  %1027 = vmatpush1.msra.mxu1 %v663_v34  ;;  %4548 = vst [vmem:[#allocation52_spill] sm:$0xff] %v3083_v38  ;;  %v3092_v34 = vld [vmem:[%s4367_s2 + $0x118] sm:$0xff]  ;;  %4551 = vst [vmem:[#allocation55_spill] sm:$0xff] %v3113_v39 }
 0x10e   :  { %831 = vmatprep.mubr.f32.mxu0 %v3064_v35  ;;  %920 = vmatprep.mubr.f32.mxu1 %v3066_v49  ;;  %4549 = vst [vmem:[#allocation53_spill] sm:$0xff] %v3092_v34  ;;  %v656_v42 = vld [vmem:[%s4367_s2 + $0x518] sm:$0xff] }
 0x10f   :  { %939 = vmatprep.subr.mxu0 %v3072_v31  ;;  %1028 = vmatprep.subr.mxu1 %v660_v30  ;;  %v3103_v30 = vld [vmem:[%s4367_s2 + $0x110] sm:$0xff] }
 0x110   :  { %832 = vmatmul.mubr.f32.gmra.mxu0 %v3030_v33  ;;  %921 = vmatmul.mubr.f32.gmra.mxu1 %v3032_v32  ;;  %4550 = vst [vmem:[#allocation54_spill] sm:$0xff] %v3103_v30  ;;  %v655_v31 = vld [vmem:[%s4367_s2 + $0x510] sm:$0xff] }
 0x111   :  { %940 = vmatpush1.msra.mxu0 %v3083_v38  ;;  %1029 = vmatpush1.msra.mxu1 %v659_v53  ;;  %v652_v53 = vld [vmem:[%s4367_s2 + $0x4f8] sm:$0xff]  ;;  %v3122_v38 = vld [vmem:[%s4367_s2 + $0xf0] sm:$0xff] }
 0x112   :  { %941 = vmatprep.subr.mxu0 %v3092_v34  ;;  %991 = vmatprep.mubr.f32.mxu0 %v2931_v51  ;;  %4552 = vst [vmem:[#allocation56_spill] sm:$0xff] %v3122_v38  ;;  %v651_v34 = vld [vmem:[%s4367_s2 + $0x4f0] sm:$0xff] }
 0x113   :  { %1030 = vmatprep.subr.mxu1 %v656_v42  ;;  %1080 = vmatprep.mubr.f32.mxu1 %v2933_v50  ;;  %v648_v42 = vld [vmem:[%s4367_s2 + $0x4d8] sm:$0xff]  ;;  %v3140_v50 = vld [vmem:[%s4367_s2 + $0xd0] sm:$0xff] }
 0x114   :  { %942 = vmatpush1.msra.mxu0 %v3103_v30  ;;  %1031 = vmatpush1.msra.mxu1 %v655_v31  ;;  %4554 = vst [vmem:[#allocation58_spill] sm:$0xff] %v3140_v50  ;;  %v647_v31 = vld [vmem:[%s4367_s2 + $0x4d0] sm:$0xff]  ;;  %v3149_v30 = vld [vmem:[%s4367_s2 + $0xb8] sm:$0xff] }
 0x115   :  { %943 = vmatprep.subr.mxu0 %v3113_v39  ;;  %1032 = vmatprep.subr.mxu1 %v652_v53  ;;  %4555 = vst [vmem:[#allocation59_spill] sm:$0xff] %v3149_v30  ;;  %v644_v53 = vld [vmem:[%s4367_s2 + $0x4b8] sm:$0xff]  ;;  %v3158_v39 = vld [vmem:[%s4367_s2 + $0xb0] sm:$0xff] }
 0x116   :  { %944 = vmatpush1.msra.mxu0 %v3122_v38  ;;  %1033 = vmatpush1.msra.mxu1 %v651_v34  ;;  %4556 = vst [vmem:[#allocation60_spill] sm:$0xff] %v3158_v39  ;;  %v643_v34 = vld [vmem:[%s4367_s2 + $0x4b0] sm:$0xff]  ;;  %v3167_v38 = vld [vmem:[%s4367_s2 + $0x98] sm:$0xff] }
 0x117   :  { %945 = vmatprep.subr.mxu0 %v3131_v43  ;;  %1034 = vmatprep.subr.mxu1 %v648_v42  ;;  %4557 = vst [vmem:[#allocation61_spill] sm:$0xff] %v3167_v38  ;;  %v640_v42 = vld [vmem:[%s4367_s2 + $0x498] sm:$0xff]  ;;  %v3176_v43 = vld [vmem:[%s4367_s2 + $0x90] sm:$0xff] }
 0x118   :  { %946 = vmatpush1.msra.mxu0 %v3140_v50  ;;  %1035 = vmatpush1.msra.mxu1 %v647_v31  ;;  %4558 = vst [vmem:[#allocation62_spill] sm:$0xff] %v3176_v43  ;;  %v639_v31 = vld [vmem:[%s4367_s2 + $0x490] sm:$0xff]  ;;  %v3185_v50 = vld [vmem:[%s4367_s2 + $0x78] sm:$0xff] }
 0x119   :  { %947 = vmatprep.subr.mxu0 %v3149_v30  ;;  %1036 = vmatprep.subr.mxu1 %v644_v53  ;;  %4559 = vst [vmem:[#allocation63_spill] sm:$0xff] %v3185_v50  ;;  %v636_v53 = vld [vmem:[%s4367_s2 + $0x478] sm:$0xff]  ;;  %v3194_v30 = vld [vmem:[%s4367_s2 + $0x70] sm:$0xff] }
 0x11a   :  { %948 = vmatpush1.msra.mxu0 %v3158_v39  ;;  %1037 = vmatpush1.msra.mxu1 %v643_v34  ;;  %4560 = vst [vmem:[#allocation64_spill] sm:$0xff] %v3194_v30  ;;  %v635_v34 = vld [vmem:[%s4367_s2 + $0x470] sm:$0xff]  ;;  %v3203_v39 = vld [vmem:[%s4367_s2 + $0x58] sm:$0xff] }
 0x11b   :  { %949 = vmatprep.subr.mxu0 %v3167_v38  ;;  %1038 = vmatprep.subr.mxu1 %v640_v42  ;;  %4561 = vst [vmem:[#allocation65_spill] sm:$0xff] %v3203_v39  ;;  %v632_v42 = vld [vmem:[%s4367_s2 + $0x458] sm:$0xff]  ;;  %v3212_v38 = vld [vmem:[%s4367_s2 + $0x50] sm:$0xff] }
 0x11c   :  { %950 = vmatpush1.msra.mxu0 %v3176_v43  ;;  %1039 = vmatpush1.msra.mxu1 %v639_v31  ;;  %4562 = vst [vmem:[#allocation66_spill] sm:$0xff] %v3212_v38  ;;  %v631_v31 = vld [vmem:[%s4367_s2 + $0x450] sm:$0xff]  ;;  %v3221_v43 = vld [vmem:[%s4367_s2 + $0x38] sm:$0xff] }
 0x11d   :  { %951 = vmatprep.subr.mxu0 %v3185_v50  ;;  %1040 = vmatprep.subr.mxu1 %v636_v53  ;;  %4563 = vst [vmem:[#allocation67_spill] sm:$0xff] %v3221_v43  ;;  %v628_v53 = vld [vmem:[%s4367_s2 + $0x438] sm:$0xff]  ;;  %v3230_v50 = vld [vmem:[%s4367_s2 + $0x30] sm:$0xff] }
 0x11e   :  { %952 = vmatpush1.msra.mxu0 %v3194_v30  ;;  %1041 = vmatpush1.msra.mxu1 %v635_v34  ;;  %4564 = vst [vmem:[#allocation68_spill] sm:$0xff] %v3230_v50  ;;  %v627_v34 = vld [vmem:[%s4367_s2 + $0x430] sm:$0xff]  ;;  %v3239_v30 = vld [vmem:[%s4367_s2 + $0x18] sm:$0xff] }
 0x11f   :  { %953 = vmatprep.subr.mxu0 %v3203_v39  ;;  %1042 = vmatprep.subr.mxu1 %v632_v42  ;;  %4565 = vst [vmem:[#allocation69_spill] sm:$0xff] %v3239_v30  ;;  %v624_v42 = vld [vmem:[%s4367_s2 + $0x418] sm:$0xff]  ;;  %v3248_v39 = vld [vmem:[%s4367_s2 + $0x10] sm:$0xff] }
 0x120   :  { %954 = vmatpush1.msra.mxu0 %v3212_v38  ;;  %1043 = vmatpush1.msra.mxu1 %v631_v31  ;;  %4566 = vst [vmem:[#allocation70_spill] sm:$0xff] %v3248_v39  ;;  %v623_v31 = vld [vmem:[%s4367_s2 + $0x410] sm:$0xff]  ;;  %v3257_v38 = vld [vmem:[%s4367_s2 + $0x3f8] sm:$0xff] }
 0x121   :  { %955 = vmatprep.subr.mxu0 %v3221_v43  ;;  %1044 = vmatprep.subr.mxu1 %v628_v53  ;;  %v748_v53 = vld [vmem:[%s4367_s2 + $0x7f8] sm:$0xff]  ;;  %v3266_v43 = vld [vmem:[%s4367_s2 + $0x3f0] sm:$0xff] }
 0x122   :  { %956 = vmatpush1.msra.mxu0 %v3230_v50  ;;  %1045 = vmatpush1.msra.mxu1 %v627_v34  ;;  %4567 = vst [vmem:[#allocation71_spill] sm:$0xff] %v3266_v43  ;;  %v3271_v34 = vld [vmem:[%s4367_s2 + $0x7f0] sm:$0xff]  ;;  %v3277_v50 = vld [vmem:[%s4367_s2 + $0x3d8] sm:$0xff] }
 0x123   :  { %957 = vmatprep.subr.mxu0 %v3239_v30  ;;  %1046 = vmatprep.subr.mxu1 %v624_v42  ;;  %4568 = vst [vmem:[#allocation72_spill] sm:$0xff] %v3271_v34  ;;  %4569 = vst [vmem:[#allocation73_spill] sm:$0xff] %v3277_v50  ;;  %v3282_v42 = vld [vmem:[%s4367_s2 + $0x7d8] sm:$0xff]  ;;  %v3288_v30 = vld [vmem:[%s4367_s2 + $0x3d0] sm:$0xff] }
 0x124   :  { %958 = vmatpush1.msra.mxu0 %v3248_v39  ;;  %1047 = vmatpush1.msra.mxu1 %v623_v31  ;;  %4570 = vst [vmem:[#allocation74_spill] sm:$0xff] %v3282_v42  ;;  %4571 = vst [vmem:[#allocation75_spill] sm:$0xff] %v3288_v30  ;;  %v3293_v31 = vld [vmem:[%s4367_s2 + $0x7d0] sm:$0xff]  ;;  %v3300_v39 = vld [vmem:[%s4367_s2 + $0x3b8] sm:$0xff] }
 0x125   :  { %959 = vmatprep.subr.mxu0 %v3257_v38  ;;  %1048 = vmatprep.subr.mxu1 %v748_v53  ;;  %4572 = vst [vmem:[#allocation76_spill] sm:$0xff] %v3293_v31  ;;  %4573 = vst [vmem:[#allocation77_spill] sm:$0xff] %v3300_v39  ;;  %v3305_v53 = vld [vmem:[%s4367_s2 + $0x7b8] sm:$0xff] }
 0x126   :  { %960 = vmatpush2.msra.mxu0 %v3266_v43  ;;  %1049 = vmatpush2.msra.mxu1 %v3271_v34  ;;  %4574 = vst [vmem:[#allocation78_spill] sm:$0xff] %v3305_v53  ;;  %v3312_v43 = vld [vmem:[%s4367_s2 + $0x3b0] sm:$0xff] }
 0x127   :  { %961 = vmatprep.subr.mxu0 %v3277_v50  ;;  %1050 = vmatprep.subr.mxu1 %v3282_v42  ;;  %4575 = vst [vmem:[#allocation79_spill] sm:$0xff] %v3312_v43  ;;  %v3317_v34 = vld [vmem:[%s4367_s2 + $0x7b0] sm:$0xff]  ;;  %v3324_v50 = vld [vmem:[%s4367_s2 + $0x398] sm:$0xff] }
 0x128   :  { %4576 = vst [vmem:[#allocation80_spill] sm:$0xff] %v3317_v34  ;;  %962 = vmatpush2.msra.mxu0 %v3288_v30  ;;  %1051 = vmatpush2.msra.mxu1 %v3293_v31  ;;  %4577 = vst [vmem:[#allocation81_spill] sm:$0xff] %v3324_v50  ;;  %v3329_v42 = vld [vmem:[%s4367_s2 + $0x798] sm:$0xff]  ;;  %v3336_v30 = vld [vmem:[%s4367_s2 + $0x390] sm:$0xff] }
 0x129   :  { %4578 = vst [vmem:[#allocation82_spill] sm:$0xff] %v3329_v42  ;;  %963 = vmatprep.subr.mxu0 %v3300_v39  ;;  %1052 = vmatprep.subr.mxu1 %v3305_v53  ;;  %4579 = vst [vmem:[#allocation83_spill] sm:$0xff] %v3336_v30  ;;  %v3341_v31 = vld [vmem:[%s4367_s2 + $0x790] sm:$0xff]  ;;  %v3348_v39 = vld [vmem:[%s4367_s2 + $0x378] sm:$0xff] }
 0x12a   :  { %4580 = vst [vmem:[#allocation84_spill] sm:$0xff] %v3341_v31  ;;  %964 = vmatpush2.msra.mxu0 %v3312_v43  ;;  %1053 = vmatpush2.msra.mxu1 %v3317_v34  ;;  %4581 = vst [vmem:[#allocation85_spill] sm:$0xff] %v3348_v39  ;;  %v3353_v53 = vld [vmem:[%s4367_s2 + $0x778] sm:$0xff]  ;;  %v3360_v43 = vld [vmem:[%s4367_s2 + $0x370] sm:$0xff] }
 0x12b   :  { %4582 = vst [vmem:[#allocation86_spill] sm:$0xff] %v3353_v53  ;;  %965 = vmatprep.subr.mxu0 %v3324_v50  ;;  %1054 = vmatprep.subr.mxu1 %v3329_v42  ;;  %4583 = vst [vmem:[#allocation87_spill] sm:$0xff] %v3360_v43  ;;  %v3365_v34 = vld [vmem:[%s4367_s2 + $0x770] sm:$0xff]  ;;  %v3372_v50 = vld [vmem:[%s4367_s2 + $0x358] sm:$0xff] }
 0x12c   :  { %4584 = vst [vmem:[#allocation88_spill] sm:$0xff] %v3365_v34  ;;  %966 = vmatpush2.msra.mxu0 %v3336_v30  ;;  %1055 = vmatpush2.msra.mxu1 %v3341_v31  ;;  %4585 = vst [vmem:[#allocation89_spill] sm:$0xff] %v3372_v50  ;;  %v3377_v42 = vld [vmem:[%s4367_s2 + $0x758] sm:$0xff]  ;;  %v3384_v30 = vld [vmem:[%s4367_s2 + $0x350] sm:$0xff] }
 0x12d   :  { %4586 = vst [vmem:[#allocation90_spill] sm:$0xff] %v3377_v42  ;;  %967 = vmatprep.subr.mxu0 %v3348_v39  ;;  %1056 = vmatprep.subr.mxu1 %v3353_v53  ;;  %4587 = vst [vmem:[#allocation91_spill] sm:$0xff] %v3384_v30  ;;  %v3389_v31 = vld [vmem:[%s4367_s2 + $0x750] sm:$0xff]  ;;  %v3396_v39 = vld [vmem:[%s4367_s2 + $0x338] sm:$0xff] }
 0x12e   :  { %4588 = vst [vmem:[#allocation92_spill] sm:$0xff] %v3389_v31  ;;  %968 = vmatpush2.msra.mxu0 %v3360_v43  ;;  %1057 = vmatpush2.msra.mxu1 %v3365_v34  ;;  %4589 = vst [vmem:[#allocation93_spill] sm:$0xff] %v3396_v39  ;;  %v3401_v53 = vld [vmem:[%s4367_s2 + $0x738] sm:$0xff]  ;;  %v3408_v43 = vld [vmem:[%s4367_s2 + $0x330] sm:$0xff] }
 0x12f   :  { %4590 = vst [vmem:[#allocation94_spill] sm:$0xff] %v3401_v53  ;;  %969 = vmatprep.subr.mxu0 %v3372_v50  ;;  %1058 = vmatprep.subr.mxu1 %v3377_v42  ;;  %4591 = vst [vmem:[#allocation95_spill] sm:$0xff] %v3408_v43  ;;  %v3413_v34 = vld [vmem:[%s4367_s2 + $0x730] sm:$0xff]  ;;  %v3420_v50 = vld [vmem:[%s4367_s2 + $0x318] sm:$0xff] }
 0x130   :  { %4592 = vst [vmem:[#allocation96_spill] sm:$0xff] %v3413_v34  ;;  %970 = vmatpush2.msra.mxu0 %v3384_v30  ;;  %1059 = vmatpush2.msra.mxu1 %v3389_v31  ;;  %4593 = vst [vmem:[#allocation97_spill] sm:$0xff] %v3420_v50  ;;  %v3425_v42 = vld [vmem:[%s4367_s2 + $0x718] sm:$0xff]  ;;  %v3432_v30 = vld [vmem:[%s4367_s2 + $0x310] sm:$0xff] }
 0x131   :  { %4594 = vst [vmem:[#allocation98_spill] sm:$0xff] %v3425_v42  ;;  %971 = vmatprep.subr.mxu0 %v3396_v39  ;;  %1060 = vmatprep.subr.mxu1 %v3401_v53  ;;  %4595 = vst [vmem:[#allocation99_spill] sm:$0xff] %v3432_v30  ;;  %v3437_v31 = vld [vmem:[%s4367_s2 + $0x710] sm:$0xff]  ;;  %v3444_v39 = vld [vmem:[%s4367_s2 + $0x2f8] sm:$0xff] }
 0x132   :  { %4596 = vst [vmem:[#allocation100_spill] sm:$0xff] %v3437_v31  ;;  %972 = vmatpush2.msra.mxu0 %v3408_v43  ;;  %1061 = vmatpush2.msra.mxu1 %v3413_v34  ;;  %4597 = vst [vmem:[#allocation101_spill] sm:$0xff] %v3444_v39  ;;  %v3449_v53 = vld [vmem:[%s4367_s2 + $0x6f8] sm:$0xff]  ;;  %v3456_v43 = vld [vmem:[%s4367_s2 + $0x2f0] sm:$0xff] }
 0x133   :  { %4598 = vst [vmem:[#allocation102_spill] sm:$0xff] %v3449_v53  ;;  %973 = vmatprep.subr.mxu0 %v3420_v50  ;;  %1062 = vmatprep.subr.mxu1 %v3425_v42  ;;  %4599 = vst [vmem:[#allocation103_spill] sm:$0xff] %v3456_v43  ;;  %v3461_v34 = vld [vmem:[%s4367_s2 + $0x6f0] sm:$0xff]  ;;  %v3468_v50 = vld [vmem:[%s4367_s2 + $0x2d8] sm:$0xff] }
 0x134   :  { %4600 = vst [vmem:[#allocation104_spill] sm:$0xff] %v3461_v34  ;;  %974 = vmatpush2.msra.mxu0 %v3432_v30  ;;  %1063 = vmatpush2.msra.mxu1 %v3437_v31  ;;  %4601 = vst [vmem:[#allocation105_spill] sm:$0xff] %v3468_v50  ;;  %v3473_v42 = vld [vmem:[%s4367_s2 + $0x6d8] sm:$0xff]  ;;  %v3480_v30 = vld [vmem:[%s4367_s2 + $0x2d0] sm:$0xff] }
 0x135   :  { %4602 = vst [vmem:[#allocation106_spill] sm:$0xff] %v3473_v42  ;;  %975 = vmatprep.subr.mxu0 %v3444_v39  ;;  %1064 = vmatprep.subr.mxu1 %v3449_v53  ;;  %4603 = vst [vmem:[#allocation107_spill] sm:$0xff] %v3480_v30  ;;  %v3485_v31 = vld [vmem:[%s4367_s2 + $0x6d0] sm:$0xff]  ;;  %v3492_v39 = vld [vmem:[%s4367_s2 + $0x2b8] sm:$0xff] }
 0x136   :  { %4604 = vst [vmem:[#allocation108_spill] sm:$0xff] %v3485_v31  ;;  %976 = vmatpush2.msra.mxu0 %v3456_v43  ;;  %1065 = vmatpush2.msra.mxu1 %v3461_v34  ;;  %4605 = vst [vmem:[#allocation109_spill] sm:$0xff] %v3492_v39  ;;  %v3497_v53 = vld [vmem:[%s4367_s2 + $0x6b8] sm:$0xff]  ;;  %v3504_v43 = vld [vmem:[%s4367_s2 + $0x2b0] sm:$0xff] }
 0x137   :  { %4606 = vst [vmem:[#allocation110_spill] sm:$0xff] %v3497_v53  ;;  %977 = vmatprep.subr.mxu0 %v3468_v50  ;;  %1066 = vmatprep.subr.mxu1 %v3473_v42  ;;  %4607 = vst [vmem:[#allocation111_spill] sm:$0xff] %v3504_v43  ;;  %v3509_v34 = vld [vmem:[%s4367_s2 + $0x6b0] sm:$0xff]  ;;  %v3516_v50 = vld [vmem:[%s4367_s2 + $0x298] sm:$0xff] }
 0x138   :  { %4608 = vst [vmem:[#allocation112_spill] sm:$0xff] %v3509_v34  ;;  %978 = vmatpush2.msra.mxu0 %v3480_v30  ;;  %1067 = vmatpush2.msra.mxu1 %v3485_v31  ;;  %4609 = vst [vmem:[#allocation113_spill] sm:$0xff] %v3516_v50  ;;  %v3521_v42 = vld [vmem:[%s4367_s2 + $0x698] sm:$0xff]  ;;  %v3528_v30 = vld [vmem:[%s4367_s2 + $0x290] sm:$0xff] }
 0x139   :  { %4610 = vst [vmem:[#allocation114_spill] sm:$0xff] %v3521_v42  ;;  %979 = vmatprep.subr.mxu0 %v3492_v39  ;;  %1068 = vmatprep.subr.mxu1 %v3497_v53  ;;  %4611 = vst [vmem:[#allocation115_spill] sm:$0xff] %v3528_v30  ;;  %v3533_v31 = vld [vmem:[%s4367_s2 + $0x690] sm:$0xff]  ;;  %v3540_v39 = vld [vmem:[%s4367_s2 + $0x278] sm:$0xff] }
 0x13a   :  { %4612 = vst [vmem:[#allocation116_spill] sm:$0xff] %v3533_v31  ;;  %980 = vmatpush2.msra.mxu0 %v3504_v43  ;;  %1069 = vmatpush2.msra.mxu1 %v3509_v34  ;;  %4613 = vst [vmem:[#allocation117_spill] sm:$0xff] %v3540_v39  ;;  %v3545_v53 = vld [vmem:[%s4367_s2 + $0x678] sm:$0xff]  ;;  %v3552_v43 = vld [vmem:[%s4367_s2 + $0x270] sm:$0xff] }
 0x13b   :  { %4614 = vst [vmem:[#allocation118_spill] sm:$0xff] %v3545_v53  ;;  %981 = vmatprep.subr.mxu0 %v3516_v50  ;;  %1070 = vmatprep.subr.mxu1 %v3521_v42  ;;  %4615 = vst [vmem:[#allocation119_spill] sm:$0xff] %v3552_v43  ;;  %v3557_v34 = vld [vmem:[%s4367_s2 + $0x670] sm:$0xff]  ;;  %v3564_v50 = vld [vmem:[%s4367_s2 + $0x258] sm:$0xff] }
 0x13c   :  { %4616 = vst [vmem:[#allocation120_spill] sm:$0xff] %v3557_v34  ;;  %982 = vmatpush2.msra.mxu0 %v3528_v30  ;;  %1071 = vmatpush2.msra.mxu1 %v3533_v31  ;;  %4617 = vst [vmem:[#allocation121_spill] sm:$0xff] %v3564_v50  ;;  %v3569_v42 = vld [vmem:[%s4367_s2 + $0x658] sm:$0xff]  ;;  %v3576_v30 = vld [vmem:[%s4367_s2 + $0x250] sm:$0xff] }
 0x13d   :  { %4618 = vst [vmem:[#allocation122_spill] sm:$0xff] %v3569_v42  ;;  %983 = vmatprep.subr.mxu0 %v3540_v39  ;;  %1072 = vmatprep.subr.mxu1 %v3545_v53  ;;  %4619 = vst [vmem:[#allocation123_spill] sm:$0xff] %v3576_v30  ;;  %v3581_v31 = vld [vmem:[%s4367_s2 + $0x650] sm:$0xff]  ;;  %v3588_v39 = vld [vmem:[%s4367_s2 + $0x238] sm:$0xff] }
 0x13e   :  { %4620 = vst [vmem:[#allocation124_spill] sm:$0xff] %v3581_v31  ;;  %984 = vmatpush2.msra.mxu0 %v3552_v43  ;;  %1073 = vmatpush2.msra.mxu1 %v3557_v34  ;;  %v3593_v53 = vld [vmem:[%s4367_s2 + $0x638] sm:$0xff]  ;;  %v3600_v43 = vld [vmem:[%s4367_s2 + $0x230] sm:$0xff] }
 0x13f   :  { %4621 = vst [vmem:[#allocation125_spill] sm:$0xff] %v3593_v53  ;;  %985 = vmatprep.subr.mxu0 %v3564_v50  ;;  %1074 = vmatprep.subr.mxu1 %v3569_v42  ;;  %v3605_v34 = vld [vmem:[%s4367_s2 + $0x630] sm:$0xff]  ;;  %v3612_v50 = vld [vmem:[%s4367_s2 + $0x218] sm:$0xff] }
 0x140   :  { %4622 = vst [vmem:[#allocation126_spill] sm:$0xff] %v3605_v34  ;;  %986 = vmatpush2.msra.mxu0 %v3576_v30  ;;  %1075 = vmatpush2.msra.mxu1 %v3581_v31  ;;  %v3617_v42 = vld [vmem:[%s4367_s2 + $0x618] sm:$0xff]  ;;  %v3624_v30 = vld [vmem:[%s4367_s2 + $0x210] sm:$0xff] }
 0x141   :  { %4623 = vst [vmem:[#allocation127_spill] sm:$0xff] %v3617_v42  ;;  %987 = vmatprep.subr.mxu0 %v3588_v39  ;;  %1076 = vmatprep.subr.mxu1 %v3593_v53  ;;  %v3629_v31 = vld [vmem:[%s4367_s2 + $0x610] sm:$0xff]  ;;  %v2017_v53 = vld [vmem:[%s4367_s2 + $0x5e0] sm:$0xff] }
 0x142   :  { %4624 = vst [vmem:[#allocation128_spill] sm:$0xff] %v3629_v31  ;;  %988 = vmatpush2.msra.mxu0 %v3600_v43  ;;  %1077 = vmatpush2.msra.mxu1 %v3605_v34  ;;  %v2014_v34 = vld [vmem:[%s4367_s2 + $0x1e8] sm:$0xff] }
 0x143   :  { %989 = vmatprep.subr.mxu0 %v3612_v50  ;;  %1078 = vmatprep.subr.mxu1 %v3617_v42  ;;  %v2015_v42 = vld [vmem:[%s4367_s2 + $0x5e8] sm:$0xff] }
 0x144   :  { %990 = vmatpush2.msra.mxu0 %v3624_v30  ;;  %1079 = vmatpush2.msra.mxu1 %v3629_v31  ;;  %v2016_v31 = vld [vmem:[%s4367_s2 + $0x1e0] sm:$0xff] }
 0x145   :  { %992 = vmatmul.mubr.f32.vlgmr.msra.gmra.mxu0 %v2927_v47  ;;  %1081 = vmatmul.mubr.f32.vlgmr.msra.gmra.mxu1 %v2929_v46 }
 0x146   :  { %997 = vmatprep.mubr.f32.mxu0 %v2969_v41  ;;  %1086 = vmatprep.mubr.f32.mxu1 %v2971_v40 }
 0x147   :  { %1177 = vmatprep.subr.mxu0 %v2014_v34  ;;  %1266 = vmatprep.subr.mxu1 %v2015_v42  ;;  %v2018_v34 = vld [vmem:[%s4367_s2 + $0x1c8] sm:$0xff] }
 0x148   :  { %1178 = vmatpush1.msra.mxu0 %v2016_v31  ;;  %1267 = vmatpush1.msra.mxu1 %v2017_v53  ;;  %v2019_v42 = vld [vmem:[%s4367_s2 + $0x5c8] sm:$0xff]  ;;  %v2020_v31 = vld [vmem:[%s4367_s2 + $0x1c0] sm:$0xff] }
 0x149   :  { %998 = vmatmul.mubr.f32.gmra.mxu0 %v2953_v45  ;;  %1087 = vmatmul.mubr.f32.gmra.mxu1 %v2955_v44  ;;  %v2021_v53 = vld [vmem:[%s4367_s2 + $0x5c0] sm:$0xff] }
 0x14a   :  { %1003 = vmatprep.mubr.f32.mxu0 %v3007_v37  ;;  %1092 = vmatprep.mubr.f32.mxu1 %v3009_v36 }
 0x14b   :  { %1179 = vmatprep.subr.mxu0 %v2018_v34  ;;  %1268 = vmatprep.subr.mxu1 %v2019_v42  ;;  %v2022_v34 = vld [vmem:[%s4367_s2 + $0x1a8] sm:$0xff] }
 0x14c   :  { %1180 = vmatpush1.msra.mxu0 %v2020_v31  ;;  %1269 = vmatpush1.msra.mxu1 %v2021_v53  ;;  %v2023_v42 = vld [vmem:[%s4367_s2 + $0x5a8] sm:$0xff]  ;;  %v2024_v31 = vld [vmem:[%s4367_s2 + $0x1a0] sm:$0xff] }
 0x14d   :  { %1004 = vmatmul.mubr.f32.gmra.mxu0 %v2984_v48  ;;  %1093 = vmatmul.mubr.f32.gmra.mxu1 %v2986_v52  ;;  %v2025_v53 = vld [vmem:[%s4367_s2 + $0x5a0] sm:$0xff] }
 0x14e   :  { %1009 = vmatprep.mubr.f32.mxu0 %v3064_v35  ;;  %1098 = vmatprep.mubr.f32.mxu1 %v3066_v49 }
 0x14f   :  { %1181 = vmatprep.subr.mxu0 %v2022_v34  ;;  %1270 = vmatprep.subr.mxu1 %v2023_v42  ;;  %v2026_v34 = vld [vmem:[%s4367_s2 + $0x188] sm:$0xff] }
 0x150   :  { %1182 = vmatpush1.msra.mxu0 %v2024_v31  ;;  %1271 = vmatpush1.msra.mxu1 %v2025_v53  ;;  %v2027_v42 = vld [vmem:[%s4367_s2 + $0x588] sm:$0xff]  ;;  %v2028_v31 = vld [vmem:[%s4367_s2 + $0x180] sm:$0xff] }
 0x151   :  { %1010 = vmatmul.mubr.f32.gmra.mxu0 %v3030_v33  ;;  %1099 = vmatmul.mubr.f32.gmra.mxu1 %v3032_v32  ;;  %v2029_v53 = vld [vmem:[%s4367_s2 + $0x580] sm:$0xff]  ;;  %v2030_v32 = vld [vmem:[%s4367_s2 + $0x168] sm:$0xff] }
 0x152   :  { %1183 = vmatprep.subr.mxu0 %v2026_v34  ;;  %1272 = vmatprep.subr.mxu1 %v2027_v42  ;;  %v2031_v34 = vld [vmem:[%s4367_s2 + $0x568] sm:$0xff]  ;;  %v2032_v42 = vld [vmem:[%s4367_s2 + $0x160] sm:$0xff] }
 0x153   :  { %1184 = vmatpush1.msra.mxu0 %v2028_v31  ;;  %1273 = vmatpush1.msra.mxu1 %v2029_v53  ;;  %v2033_v31 = vld [vmem:[%s4367_s2 + $0x560] sm:$0xff]  ;;  %v2034_v53 = vld [vmem:[%s4367_s2 + $0x148] sm:$0xff] }
 0x154   :  { %1185 = vmatprep.subr.mxu0 %v2030_v32  ;;  %1274 = vmatprep.subr.mxu1 %v2031_v34  ;;  %v2035_v32 = vld [vmem:[%s4367_s2 + $0x548] sm:$0xff]  ;;  %v2036_v34 = vld [vmem:[%s4367_s2 + $0x140] sm:$0xff] }
 0x155   :  { %1186 = vmatpush1.msra.mxu0 %v2032_v42  ;;  %1275 = vmatpush1.msra.mxu1 %v2033_v31  ;;  %v2037_v42 = vld [vmem:[%s4367_s2 + $0x540] sm:$0xff]  ;;  %v2038_v31 = vld [vmem:[%s4367_s2 + $0x128] sm:$0xff] }
 0x156   :  { %1187 = vmatprep.subr.mxu0 %v2034_v53  ;;  %1276 = vmatprep.subr.mxu1 %v2035_v32  ;;  %v2039_v53 = vld [vmem:[%s4367_s2 + $0x528] sm:$0xff]  ;;  %v2040_v32 = vld [vmem:[%s4367_s2 + $0x120] sm:$0xff] }
 0x157   :  { %1188 = vmatpush1.msra.mxu0 %v2036_v34  ;;  %1277 = vmatpush1.msra.mxu1 %v2037_v42  ;;  %v2041_v34 = vld [vmem:[%s4367_s2 + $0x520] sm:$0xff]  ;;  %v2042_v42 = vld [vmem:[%s4367_s2 + $0x108] sm:$0xff] }
 0x158   :  { %1189 = vmatprep.subr.mxu0 %v2038_v31  ;;  %1278 = vmatprep.subr.mxu1 %v2039_v53  ;;  %v2043_v31 = vld [vmem:[%s4367_s2 + $0x508] sm:$0xff]  ;;  %v2044_v53 = vld [vmem:[%s4367_s2 + $0x100] sm:$0xff] }
 0x159   :  { %1190 = vmatpush1.msra.mxu0 %v2040_v32  ;;  %1279 = vmatpush1.msra.mxu1 %v2041_v34  ;;  %v2045_v32 = vld [vmem:[%s4367_s2 + $0x500] sm:$0xff]  ;;  %v2046_v34 = vld [vmem:[%s4367_s2 + $0xe8] sm:$0xff] }
 0x15a   :  { %1191 = vmatprep.subr.mxu0 %v2042_v42  ;;  %1280 = vmatprep.subr.mxu1 %v2043_v31  ;;  %v2047_v42 = vld [vmem:[%s4367_s2 + $0x4e8] sm:$0xff]  ;;  %v2048_v31 = vld [vmem:[%s4367_s2 + $0xe0] sm:$0xff] }
 0x15b   :  { %1192 = vmatpush1.msra.mxu0 %v2044_v53  ;;  %1281 = vmatpush1.msra.mxu1 %v2045_v32  ;;  %v2049_v53 = vld [vmem:[%s4367_s2 + $0x4e0] sm:$0xff]  ;;  %v2050_v32 = vld [vmem:[%s4367_s2 + $0xc8] sm:$0xff] }
 0x15c   :  { %1193 = vmatprep.subr.mxu0 %v2046_v34  ;;  %1282 = vmatprep.subr.mxu1 %v2047_v42  ;;  %v2051_v34 = vld [vmem:[%s4367_s2 + $0x4c8] sm:$0xff]  ;;  %v2052_v42 = vld [vmem:[%s4367_s2 + $0xc0] sm:$0xff] }
 0x15d   :  { %1194 = vmatpush1.msra.mxu0 %v2048_v31  ;;  %1283 = vmatpush1.msra.mxu1 %v2049_v53  ;;  %v2053_v31 = vld [vmem:[%s4367_s2 + $0x4c0] sm:$0xff]  ;;  %v2054_v53 = vld [vmem:[%s4367_s2 + $0xa8] sm:$0xff] }
 0x15e   :  { %1195 = vmatprep.subr.mxu0 %v2050_v32  ;;  %1284 = vmatprep.subr.mxu1 %v2051_v34  ;;  %v2055_v32 = vld [vmem:[%s4367_s2 + $0x4a8] sm:$0xff]  ;;  %v2056_v34 = vld [vmem:[%s4367_s2 + $0xa0] sm:$0xff] }
 0x15f   :  { %1196 = vmatpush1.msra.mxu0 %v2052_v42  ;;  %1285 = vmatpush1.msra.mxu1 %v2053_v31  ;;  %v2057_v42 = vld [vmem:[%s4367_s2 + $0x4a0] sm:$0xff]  ;;  %v2058_v31 = vld [vmem:[%s4367_s2 + $0x88] sm:$0xff] }
 0x160   :  { %1197 = vmatprep.subr.mxu0 %v2054_v53  ;;  %1286 = vmatprep.subr.mxu1 %v2055_v32  ;;  %v2059_v53 = vld [vmem:[%s4367_s2 + $0x488] sm:$0xff]  ;;  %v2060_v32 = vld [vmem:[%s4367_s2 + $0x80] sm:$0xff] }
 0x161   :  { %1198 = vmatpush1.msra.mxu0 %v2056_v34  ;;  %1287 = vmatpush1.msra.mxu1 %v2057_v42  ;;  %v2061_v34 = vld [vmem:[%s4367_s2 + $0x480] sm:$0xff]  ;;  %v2062_v42 = vld [vmem:[%s4367_s2 + $0x68] sm:$0xff] }
 0x162   :  { %1199 = vmatprep.subr.mxu0 %v2058_v31  ;;  %1288 = vmatprep.subr.mxu1 %v2059_v53  ;;  %v2063_v31 = vld [vmem:[%s4367_s2 + $0x468] sm:$0xff]  ;;  %v2064_v53 = vld [vmem:[%s4367_s2 + $0x60] sm:$0xff] }
 0x163   :  { %1200 = vmatpush1.msra.mxu0 %v2060_v32  ;;  %1289 = vmatpush1.msra.mxu1 %v2061_v34  ;;  %v2065_v32 = vld [vmem:[%s4367_s2 + $0x460] sm:$0xff]  ;;  %v2066_v34 = vld [vmem:[%s4367_s2 + $0x48] sm:$0xff] }
 0x164   :  { %1201 = vmatprep.subr.mxu0 %v2062_v42  ;;  %1290 = vmatprep.subr.mxu1 %v2063_v31  ;;  %v2067_v42 = vld [vmem:[%s4367_s2 + $0x448] sm:$0xff] }
 0x165   :  { %1202 = vmatpush1.msra.mxu0 %v2064_v53  ;;  %1291 = vmatpush1.msra.mxu1 %v2065_v32 }
 0x166   :  { %1203 = vmatprep.subr.mxu0 %v2066_v34  ;;  %1292 = vmatprep.subr.mxu1 %v2067_v42 }
 0x167   :  { %1204 = vmatpush1.msra.mxu0 %v2474_v54  ;;  %1293 = vmatpush1.msra.mxu1 %v2479_v55  ;;  %v4625_v54 = vld [vmem:[#allocation2_spill] sm:$0xff]  ;;  %v4626_v55 = vld [vmem:[#allocation3_spill] sm:$0xff] }
 0x168   :  { %1205 = vmatprep.subr.mxu0 %v2484_v56  ;;  %1294 = vmatprep.subr.mxu1 %v2489_v57  ;;  %v4627_v56 = vld [vmem:[#allocation4_spill] sm:$0xff]  ;;  %v4628_v57 = vld [vmem:[#allocation5_spill] sm:$0xff] }
 0x169   :  { %1206 = vmatpush1.msra.mxu0 %v2494_v58  ;;  %1295 = vmatpush1.msra.mxu1 %v2499_v59  ;;  %v4629_v58 = vld [vmem:[#allocation6_spill] sm:$0xff]  ;;  %v4630_v59 = vld [vmem:[#allocation7_spill] sm:$0xff] }
 0x16a   :  { %1207 = vmatprep.subr.mxu0 %v2506_v60  ;;  %1296 = vmatprep.subr.mxu1 %v2511_v61  ;;  %v4631_v60 = vld [vmem:[#allocation8_spill] sm:$0xff]  ;;  %v4632_v61 = vld [vmem:[#allocation9_spill] sm:$0xff] }
 0x16b   :  { %1208 = vmatpush1.msra.mxu0 %v2518_v62  ;;  %1297 = vmatpush1.msra.mxu1 %v2523_v63  ;;  %v4633_v62 = vld [vmem:[#allocation10_spill] sm:$0xff]  ;;  %v4634_v63 = vld [vmem:[#allocation11_spill] sm:$0xff] }
 0x16c   :  { %1209 = vmatprep.subr.mxu0 %v2530_v0  ;;  %1298 = vmatprep.subr.mxu1 %v2535_v1  ;;  %v4635_v0 = vld [vmem:[#allocation12_spill] sm:$0xff]  ;;  %v4636_v1 = vld [vmem:[#allocation13_spill] sm:$0xff] }
 0x16d   :  { %1210 = vmatpush2.msra.mxu0 %v2542_v2  ;;  %1299 = vmatpush2.msra.mxu1 %v2547_v3  ;;  %v4637_v2 = vld [vmem:[#allocation14_spill] sm:$0xff]  ;;  %v4638_v3 = vld [vmem:[#allocation15_spill] sm:$0xff] }
 0x16e   :  { %1211 = vmatprep.subr.mxu0 %v2554_v4  ;;  %1300 = vmatprep.subr.mxu1 %v2559_v5  ;;  %v4639_v4 = vld [vmem:[#allocation16_spill] sm:$0xff]  ;;  %v4640_v5 = vld [vmem:[#allocation17_spill] sm:$0xff] }
 0x16f   :  { %1212 = vmatpush2.msra.mxu0 %v2566_v6  ;;  %1301 = vmatpush2.msra.mxu1 %v2571_v7  ;;  %v4641_v6 = vld [vmem:[#allocation18_spill] sm:$0xff]  ;;  %v4642_v7 = vld [vmem:[#allocation19_spill] sm:$0xff] }
 0x170   :  { %1213 = vmatprep.subr.mxu0 %v2578_v8  ;;  %1302 = vmatprep.subr.mxu1 %v2583_v9  ;;  %v4643_v8 = vld [vmem:[#allocation20_spill] sm:$0xff]  ;;  %v4644_v9 = vld [vmem:[#allocation21_spill] sm:$0xff] }
 0x171   :  { %1214 = vmatpush2.msra.mxu0 %v2590_v10  ;;  %1303 = vmatpush2.msra.mxu1 %v2595_v11  ;;  %v4645_v10 = vld [vmem:[#allocation22_spill] sm:$0xff]  ;;  %v4646_v11 = vld [vmem:[#allocation23_spill] sm:$0xff] }
 0x172   :  { %1215 = vmatprep.subr.mxu0 %v2602_v12  ;;  %1304 = vmatprep.subr.mxu1 %v2607_v13  ;;  %v4647_v12 = vld [vmem:[#allocation24_spill] sm:$0xff]  ;;  %v4648_v13 = vld [vmem:[#allocation25_spill] sm:$0xff] }
 0x173   :  { %1216 = vmatpush2.msra.mxu0 %v2614_v14  ;;  %1305 = vmatpush2.msra.mxu1 %v2619_v15  ;;  %v4649_v14 = vld [vmem:[#allocation26_spill] sm:$0xff]  ;;  %v4650_v15 = vld [vmem:[#allocation27_spill] sm:$0xff] }
 0x174   :  { %1217 = vmatprep.subr.mxu0 %v2626_v16  ;;  %1306 = vmatprep.subr.mxu1 %v2631_v17  ;;  %v4651_v16 = vld [vmem:[#allocation28_spill] sm:$0xff]  ;;  %v4652_v17 = vld [vmem:[#allocation29_spill] sm:$0xff] }
 0x175   :  { %1218 = vmatpush2.msra.mxu0 %v2638_v18  ;;  %1307 = vmatpush2.msra.mxu1 %v2643_v19  ;;  %v4653_v18 = vld [vmem:[#allocation30_spill] sm:$0xff]  ;;  %v4654_v19 = vld [vmem:[#allocation31_spill] sm:$0xff] }
 0x176   :  { %1219 = vmatprep.subr.mxu0 %v2650_v20  ;;  %1308 = vmatprep.subr.mxu1 %v2655_v21  ;;  %v4655_v20 = vld [vmem:[#allocation32_spill] sm:$0xff]  ;;  %v4656_v21 = vld [vmem:[#allocation33_spill] sm:$0xff] }
 0x177   :  { %1220 = vmatpush2.msra.mxu0 %v2662_v22  ;;  %1309 = vmatpush2.msra.mxu1 %v2667_v23  ;;  %v4657_v22 = vld [vmem:[#allocation34_spill] sm:$0xff]  ;;  %v4658_v23 = vld [vmem:[#allocation35_spill] sm:$0xff] }
 0x178   :  { %1221 = vmatprep.subr.mxu0 %v2674_v24  ;;  %1310 = vmatprep.subr.mxu1 %v2679_v25  ;;  %v4659_v24 = vld [vmem:[#allocation36_spill] sm:$0xff]  ;;  %v4660_v25 = vld [vmem:[#allocation37_spill] sm:$0xff] }
 0x179   :  { %1222 = vmatpush2.msra.mxu0 %v2686_v26  ;;  %1311 = vmatpush2.msra.mxu1 %v2691_v27 }
 0x17a   :  { %1223 = vmatprep.subr.mxu0 %v2698_v28  ;;  %1312 = vmatprep.subr.mxu1 %v2703_v29 }
 0x17b   :  { %1224 = vmatpush2.msra.mxu0 %v4625_v54  ;;  %1313 = vmatpush2.msra.mxu1 %v4626_v55 }
 0x17c   :  { %1225 = vmatprep.subr.mxu0 %v4627_v56  ;;  %1314 = vmatprep.subr.mxu1 %v4628_v57 }
 0x17d   :  { %1226 = vmatpush2.msra.mxu0 %v4629_v58  ;;  %1315 = vmatpush2.msra.mxu1 %v4630_v59 }
 0x17e   :  { %1227 = vmatprep.subr.mxu0 %v4631_v60  ;;  %1316 = vmatprep.subr.mxu1 %v4632_v61 }
 0x17f   :  { %1228 = vmatpush2.msra.mxu0 %v4633_v62  ;;  %1317 = vmatpush2.msra.mxu1 %v4634_v63 }
 0x180   :  { %1229 = vmatprep.subr.mxu0 %v4635_v0  ;;  %1318 = vmatprep.subr.mxu1 %v4636_v1 }
 0x181   :  { %1230 = vmatpush2.msra.mxu0 %v4637_v2  ;;  %1319 = vmatpush2.msra.mxu1 %v4638_v3 }
 0x182   :  { %1231 = vmatprep.subr.mxu0 %v4639_v4  ;;  %1320 = vmatprep.subr.mxu1 %v4640_v5 }
 0x183   :  { %1232 = vmatpush2.msra.mxu0 %v4641_v6  ;;  %1321 = vmatpush2.msra.mxu1 %v4642_v7 }
 0x184   :  { %1233 = vmatprep.subr.mxu0 %v4643_v8  ;;  %1322 = vmatprep.subr.mxu1 %v4644_v9 }
 0x185   :  { %1234 = vmatpush2.msra.mxu0 %v4645_v10  ;;  %1323 = vmatpush2.msra.mxu1 %v4646_v11 }
 0x186   :  { %1235 = vmatprep.subr.mxu0 %v4647_v12  ;;  %1324 = vmatprep.subr.mxu1 %v4648_v13 }
 0x187   :  { %1236 = vmatpush2.msra.mxu0 %v4649_v14  ;;  %1325 = vmatpush2.msra.mxu1 %v4650_v15 }
 0x188   :  { %1237 = vmatprep.subr.mxu0 %v4651_v16  ;;  %1326 = vmatprep.subr.mxu1 %v4652_v17 }
 0x189   :  { %1238 = vmatpush2.msra.mxu0 %v4653_v18  ;;  %1327 = vmatpush2.msra.mxu1 %v4654_v19 }
 0x18a   :  { %1239 = vmatprep.subr.mxu0 %v4655_v20  ;;  %1328 = vmatprep.subr.mxu1 %v4656_v21 }
 0x18b   :  { %1240 = vmatpush2.msra.mxu0 %v4657_v22  ;;  %1329 = vmatpush2.msra.mxu1 %v4658_v23 }
 0x18c   :  { %1355 = vmatprep.subr.mxu0 %v4659_v24  ;;  %1444 = vmatprep.subr.mxu1 %v4660_v25 }
 0x1be   :  { %v815_v26 = vpop.f32.mrf.mxu0  ;;  %v904_v27 = vpop.f32.mrf.mxu1 }
 0x1bf   :  { %v905_v58 = vadd.f32 %v904_v27, %v815_v26 }
 0x1c0   :  { %v817_v28 = vpop.f32.mrf.mxu0  ;;  %v906_v29 = vpop.f32.mrf.mxu1 }
 0x1c1   :  { %v907_v61 = vadd.f32 %v906_v29, %v817_v28 }
 0x1c4   :  { %v821_v31 = vpop.f32.mrf.mxu0  ;;  %v910_v53 = vpop.f32.mrf.mxu1 }
 0x1c5   :  { %v911_v55 = vadd.f32 %v910_v53, %v821_v31  ;;  %v4662_v53 = vld [vmem:[#allocation40_spill] sm:$0xff] }
 0x1c6   :  { %v823_v32 = vpop.f32.mrf.mxu0  ;;  %v912_v34 = vpop.f32.mrf.mxu1 }
 0x1c7   :  { %v913_v59 = vadd.f32 %v912_v34, %v823_v32  ;;  %v1105_v62 = vadd.f32 %v911_v55, %v905_v58  ;;  %v4663_v34 = vld [vmem:[#allocation41_spill] sm:$0xff]  ;;  %v4665_v55 = vld [vmem:[#allocation43_spill] sm:$0xff] }
 0x1c8   :  { %v4667_v58 = vld [vmem:[#allocation45_spill] sm:$0xff] }
 0x1c9   :  { %v1114_v2 = vadd.f32 %v913_v59, %v907_v61  ;;  %v4668_v59 = vld [vmem:[#allocation46_spill] sm:$0xff]  ;;  %v4670_v61 = vld [vmem:[#allocation49_spill] sm:$0xff] }
 0x1ca   :  { %v827_v42 = vpop.f32.mrf.mxu0  ;;  %v916_v54 = vpop.f32.mrf.mxu1 }
 0x1cb   :  { %v917_v60 = vadd.f32 %v916_v54, %v827_v42  ;;  %v4664_v54 = vld [vmem:[#allocation42_spill] sm:$0xff] }
 0x1cc   :  { %v829_v56 = vpop.f32.mrf.mxu0  ;;  %v918_v57 = vpop.f32.mrf.mxu1 }
 0x1cd   :  { %v919_v63 = vadd.f32 %v918_v57, %v829_v56  ;;  %v1106_v3 = vadd.f32 %v1105_v62, %v917_v60  ;;  %v4666_v56 = vld [vmem:[#allocation44_spill] sm:$0xff]  ;;  %v4671_v62 = vld [vmem:[#allocation50_spill] sm:$0xff] }
 0x1ce   :  { %v4669_v60 = vld [vmem:[#allocation48_spill] sm:$0xff] }
 0x1cf   :  { %v1115_v7 = vadd.f32 %v1114_v2, %v919_v63  ;;  %v4672_v63 = vld [vmem:[#allocation51_spill] sm:$0xff]  ;;  %v4675_v2 = vld [vmem:[#allocation54_spill] sm:$0xff] }
 0x1d0   :  { %v833_v0 = vpop.f32.mrf.mxu0  ;;  %v922_v1 = vpop.f32.mrf.mxu1 }
 0x1d1   :  { %v923_v4 = vadd.f32 %v922_v1, %v833_v0  ;;  %v4673_v0 = vld [vmem:[#allocation52_spill] sm:$0xff]  ;;  %v4674_v1 = vld [vmem:[#allocation53_spill] sm:$0xff] }
 0x1d2   :  { %v835_v5 = vpop.f32.mrf.mxu0  ;;  %v924_v6 = vpop.f32.mrf.mxu1 }
 0x1d3   :  { %v1107_v8 = vadd.f32 %v1106_v3, %v923_v4  ;;  %v925_v9 = vadd.f32 %v924_v6, %v835_v5  ;;  %v4676_v3 = vld [vmem:[#allocation55_spill] sm:$0xff]  ;;  %v4677_v4 = vld [vmem:[#allocation56_spill] sm:$0xff]  ;;  %v4678_v5 = vld [vmem:[#allocation57_spill] sm:$0xff] }
 0x1d4   :  { %v4679_v6 = vld [vmem:[#allocation58_spill] sm:$0xff] }
 0x1d5   :  { %v1108_v10 = vrot.slane %v1107_v8, 4  ;;  %v1116_v11 = vadd.f32 %v1115_v7, %v925_v9  ;;  %v4680_v7 = vld [vmem:[#allocation59_spill] sm:$0xff]  ;;  %v4682_v9 = vld [vmem:[#allocation61_spill] sm:$0xff] }
 0x1d7   :  { %v1109_v12 = vadd.f32 %v1108_v10, %v1107_v8  ;;  %v1117_v13 = vrot.slane %v1116_v11, 4  ;;  %v4681_v8 = vld [vmem:[#allocation60_spill] sm:$0xff]  ;;  %v4683_v10 = vld [vmem:[#allocation62_spill] sm:$0xff] }
 0x1d9   :  { %v1110_v14 = vrot.slane %v1109_v12, 2  ;;  %v1118_v15 = vadd.f32 %v1117_v13, %v1116_v11  ;;  %v4684_v11 = vld [vmem:[#allocation63_spill] sm:$0xff]  ;;  %v4686_v13 = vld [vmem:[#allocation65_spill] sm:$0xff] }
 0x1db   :  { %v1111_v16 = vadd.f32 %v1110_v14, %v1109_v12  ;;  %v1119_v17 = vrot.slane %v1118_v15, 2  ;;  %v4685_v12 = vld [vmem:[#allocation64_spill] sm:$0xff] }
 0x1dd   :  { %v1112_v18 = vrot.slane %v1111_v16, 1  ;;  %v1120_v19 = vadd.f32 %v1119_v17, %v1118_v15  ;;  %v4688_v17 = vld [vmem:[#allocation67_spill] sm:$0xff] }
 0x1df   :  { %v1113_v20 = vadd.f32 %v1112_v18, %v1111_v16  ;;  %v1121_v21 = vrot.slane %v1120_v19, 1  ;;  %v4687_v16 = vld [vmem:[#allocation66_spill] sm:$0xff] }
 0x1e1   :  { %v1141_v22 = vmul.f32 0.00048828125, %v1113_v20  ;;  %v1122_v23 = vadd.f32 %v1121_v21, %v1120_v19  ;;  %v4689_v20 = vld [vmem:[#allocation68_spill] sm:$0xff]  ;;  %v4690_v21 = vld [vmem:[#allocation69_spill] sm:$0xff] }
 0x1e3   :  { %v1142_v24 = vmul.f32 0.00048828125, %v1122_v23  ;;  %v3890_v25 = vsub.f32 %v2927_v47, %v1141_v22  ;;  %v3905_v31 = vsub.f32 %v2953_v45, %v1141_v22  ;;  %v3923_v32 = vsub.f32 %v2984_v48, %v1141_v22 }
 0x1e4   :  { %v3943_v57 = vsub.f32 %v3030_v33, %v1141_v22 }
 0x1e5   :  { %v3893_v26 = vsub.f32 %v2931_v51, %v1142_v24  ;;  %v3896_v27 = vsub.f32 %v2969_v41, %v1142_v24  ;;  %v3902_v29 = vmul.f32 %v3890_v25, %v3890_v25  ;;  %v3912_v51 = vsub.f32 %v3007_v37, %v1142_v24  ;;  %v4661_v41 = vld [vmem:[#allocation39_spill] sm:$0xff] }
 0x1e6   :  { %v3920_v45 = vmul.f32 %v3905_v31, %v3905_v31  ;;  %v3931_v42 = vsub.f32 %v3064_v35, %v1142_v24  ;;  %v3940_v48 = vmul.f32 %v3923_v32, %v3923_v32  ;;  %v3957_v33 = vmul.f32 %v3943_v57, %v3943_v57  ;;  %v4691_v24 = vld [vmem:[#allocation70_spill] sm:$0xff] }
 0x1e7   :  { %v1162_v28 = vmul.f32 %v3893_v26, %v3893_v26  ;;  %v3909_v47 = vmul.f32 %v3896_v27, %v3896_v27  ;;  %v3928_v37 = vmul.f32 %v3912_v51, %v3912_v51 }
 0x1e8   :  { %v3948_v35 = vmul.f32 %v3931_v42, %v3931_v42 }
 0x1e9   :  { %1241 = vmatprep.mubr.f32.mxu0 %v1162_v28 }
 0x1ea   :  { %1242 = vmatmul.mubr.f32.vlgmr.msra.gmra.mxu0 %v3902_v29 }
 0x1eb   :  { %1356 = vmatpush1.msra.mxu0 %v4661_v41  ;;  %1247 = vmatprep.mubr.f32.mxu0 %v3909_v47 }
 0x1ec   :  { %1357 = vmatprep.subr.mxu0 %v4662_v53  ;;  %v4692_v53 = vld [vmem:[#allocation71_spill] sm:$0xff] }
 0x1ed   :  { %1358 = vmatpush1.msra.mxu0 %v4663_v34 }
 0x1ee   :  { %1359 = vmatprep.subr.mxu0 %v4664_v54  ;;  %1248 = vmatmul.mubr.f32.gmra.mxu0 %v3920_v45  ;;  %v4693_v54 = vld [vmem:[#allocation73_spill] sm:$0xff] }
 0x1ef   :  { %1360 = vmatpush1.msra.mxu0 %v4665_v55  ;;  %1253 = vmatprep.mubr.f32.mxu0 %v3928_v37 }
 0x1f0   :  { %1361 = vmatprep.subr.mxu0 %v4666_v56 }
 0x1f1   :  { %1362 = vmatpush1.msra.mxu0 %v4667_v58  ;;  %v4694_v58 = vld [vmem:[#allocation75_spill] sm:$0xff] }
 0x1f2   :  { %1363 = vmatprep.subr.mxu0 %v4668_v59  ;;  %1254 = vmatmul.mubr.f32.gmra.mxu0 %v3940_v48 }
 0x1f3   :  { %1364 = vmatpush1.msra.mxu0 %v4669_v60  ;;  %1259 = vmatprep.mubr.f32.mxu0 %v3948_v35 }
 0x1f4   :  { %1365 = vmatprep.subr.mxu0 %v4670_v61 }
 0x1f5   :  { %1366 = vmatpush1.msra.mxu0 %v4671_v62  ;;  %v4695_v62 = vld [vmem:[#allocation77_spill] sm:$0xff] }
 0x1f6   :  { %1367 = vmatprep.subr.mxu0 %v4672_v63  ;;  %1260 = vmatmul.mubr.f32.gmra.mxu0 %v3957_v33 }
 0x1f7   :  { %1368 = vmatpush1.msra.mxu0 %v4673_v0  ;;  %1419 = vmatprep.mubr.f32.mxu0 %v1162_v28 }
 0x1f8   :  { %1369 = vmatprep.subr.mxu0 %v4674_v1  ;;  %v4696_v1 = vld [vmem:[#allocation79_spill] sm:$0xff] }
 0x1f9   :  { %1370 = vmatpush1.msra.mxu0 %v4675_v2 }
 0x1fa   :  { %1371 = vmatprep.subr.mxu0 %v4676_v3 }
 0x1fb   :  { %1372 = vmatpush1.msra.mxu0 %v4677_v4  ;;  %v4697_v4 = vld [vmem:[#allocation81_spill] sm:$0xff] }
 0x1fc   :  { %1373 = vmatprep.subr.mxu0 %v4678_v5 }
 0x1fd   :  { %1374 = vmatpush1.msra.mxu0 %v4679_v6 }
 0x1fe   :  { %1375 = vmatprep.subr.mxu0 %v4680_v7  ;;  %v4698_v7 = vld [vmem:[#allocation83_spill] sm:$0xff] }
 0x1ff   :  { %1376 = vmatpush1.msra.mxu0 %v4681_v8 }
 0x200   :  { %1377 = vmatprep.subr.mxu0 %v4682_v9 }
 0x201   :  { %1378 = vmatpush1.msra.mxu0 %v4683_v10 }
 0x202   :  { %1379 = vmatprep.subr.mxu0 %v4684_v11  ;;  %v4699_v11 = vld [vmem:[#allocation85_spill] sm:$0xff] }
 0x203   :  { %1380 = vmatpush1.msra.mxu0 %v4685_v12 }
 0x204   :  { %1381 = vmatprep.subr.mxu0 %v4686_v13 }
 0x205   :  { %v993_v14 = vpop.f32.mrf.mxu0  ;;  %v1082_v15 = vpop.f32.mrf.mxu1  ;;  %1382 = vmatpush1.msra.mxu0 %v4687_v16 }
 0x206   :  { %1383 = vmatprep.subr.mxu0 %v4688_v17  ;;  %v1083_v59 = vadd.f32 %v1082_v15, %v993_v14  ;;  %v4700_v14 = vld [vmem:[#allocation87_spill] sm:$0xff] }
 0x207   :  { %v995_v18 = vpop.f32.mrf.mxu0  ;;  %v1084_v19 = vpop.f32.mrf.mxu1  ;;  %1384 = vmatpush1.msra.mxu0 %v4689_v20 }
 0x208   :  { %1385 = vmatprep.subr.mxu0 %v4690_v21 }
 0x209   :  { %v999_v22 = vpop.f32.mrf.mxu0  ;;  %v1088_v23 = vpop.f32.mrf.mxu1  ;;  %1386 = vmatpush1.msra.mxu0 %v4691_v24 }
 0x20a   :  { %1387 = vmatprep.subr.mxu0 %v3257_v38  ;;  %v1089_v34 = vadd.f32 %v1088_v23, %v999_v22  ;;  %v1085_v38 = vadd.f32 %v1084_v19, %v995_v18  ;;  %v4701_v18 = vld [vmem:[#allocation89_spill] sm:$0xff]  ;;  %v4702_v19 = vld [vmem:[#allocation91_spill] sm:$0xff] }
 0x20b   :  { %v1001_v28 = vpop.f32.mrf.mxu0  ;;  %v1090_v41 = vpop.f32.mrf.mxu1  ;;  %1388 = vmatpush2.msra.mxu0 %v4692_v53  ;;  %v4703_v22 = vld [vmem:[#allocation93_spill] sm:$0xff]  ;;  %v4704_v23 = vld [vmem:[#allocation95_spill] sm:$0xff] }
 0x20c   :  { %1389 = vmatprep.subr.mxu0 %v4693_v54  ;;  %v1091_v60 = vadd.f32 %v1090_v41, %v1001_v28  ;;  %v1123_v2 = vadd.f32 %v1089_v34, %v1083_v59  ;;  %v4705_v41 = vld [vmem:[#allocation97_spill] sm:$0xff]  ;;  %v4706_v53 = vld [vmem:[#allocation99_spill] sm:$0xff] }
 0x20d   :  { %v1005_v55 = vpop.f32.mrf.mxu0  ;;  %v1094_v56 = vpop.f32.mrf.mxu1  ;;  %1390 = vmatpush2.msra.mxu0 %v4694_v58 }
 0x20e   :  { %v1095_v61 = vadd.f32 %v1094_v56, %v1005_v55  ;;  %1391 = vmatprep.subr.mxu0 %v4695_v62  ;;  %v1132_v8 = vadd.f32 %v1091_v60, %v1085_v38  ;;  %v4707_v55 = vld [vmem:[#allocation101_spill] sm:$0xff]  ;;  %v4708_v56 = vld [vmem:[#allocation103_spill] sm:$0xff] }
 0x20f   :  { %v1007_v63 = vpop.f32.mrf.mxu0  ;;  %v1096_v0 = vpop.f32.mrf.mxu1  ;;  %1392 = vmatpush2.msra.mxu0 %v4696_v1  ;;  %v4709_v60 = vld [vmem:[#allocation105_spill] sm:$0xff]  ;;  %v4712_v1 = vld [vmem:[#allocation111_spill] sm:$0xff] }
 0x210   :  { %v1097_v3 = vadd.f32 %v1096_v0, %v1007_v63  ;;  %1393 = vmatprep.subr.mxu0 %v4697_v4  ;;  %v1124_v9 = vadd.f32 %v1123_v2, %v1095_v61  ;;  %v4710_v61 = vld [vmem:[#allocation107_spill] sm:$0xff]  ;;  %v4711_v0 = vld [vmem:[#allocation109_spill] sm:$0xff] }
 0x211   :  { %v1011_v5 = vpop.f32.mrf.mxu0  ;;  %v1100_v6 = vpop.f32.mrf.mxu1  ;;  %1394 = vmatpush2.msra.mxu0 %v4698_v7  ;;  %v4714_v4 = vld [vmem:[#allocation115_spill] sm:$0xff]  ;;  %v4715_v7 = vld [vmem:[#allocation117_spill] sm:$0xff] }
 0x212   :  { %v1101_v10 = vadd.f32 %v1100_v6, %v1011_v5  ;;  %1395 = vmatprep.subr.mxu0 %v4699_v11  ;;  %v1133_v15 = vadd.f32 %v1132_v8, %v1097_v3  ;;  %v4713_v3 = vld [vmem:[#allocation113_spill] sm:$0xff]  ;;  %v4716_v8 = vld [vmem:[#allocation119_spill] sm:$0xff] }
 0x213   :  { %v1013_v12 = vpop.f32.mrf.mxu0  ;;  %v1102_v13 = vpop.f32.mrf.mxu1  ;;  %1396 = vmatpush2.msra.mxu0 %v4700_v14  ;;  %v4718_v11 = vld [vmem:[#allocation123_spill] sm:$0xff] }
 0x214   :  { %v1125_v16 = vadd.f32 %v1124_v9, %v1101_v10  ;;  %v1103_v17 = vadd.f32 %v1102_v13, %v1013_v12  ;;  %1397 = vmatprep.subr.mxu0 %v4701_v18  ;;  %v4717_v10 = vld [vmem:[#allocation121_spill] sm:$0xff]  ;;  %v4719_v13 = vld [vmem:[#allocation38_spill] sm:$0xff] }
 0x215   :  { %1398 = vmatpush2.msra.mxu0 %v4702_v19  ;;  %v2071_v18 = vld [vmem:[%s4367_s2 + $0x5b8] sm:$0xff]  ;;  %v4720_v19 = vld [vmem:[#allocation47_spill] sm:$0xff] }
 0x216   :  { %v1126_v20 = vrot.slane %v1125_v16, 4  ;;  %v1134_v21 = vadd.f32 %v1133_v15, %v1103_v17  ;;  %1399 = vmatprep.subr.mxu0 %v4703_v22  ;;  %v2075_v22 = vld [vmem:[%s4367_s2 + $0x578] sm:$0xff] }
 0x217   :  { %1400 = vmatpush2.msra.mxu0 %v4704_v23  ;;  %v2076_v23 = vld [vmem:[%s4367_s2 + $0x570] sm:$0xff] }
 0x218   :  { %v1127_v24 = vadd.f32 %v1126_v20, %v1125_v16  ;;  %v1135_v28 = vrot.slane %v1134_v21, 4  ;;  %1401 = vmatprep.subr.mxu0 %v4705_v41  ;;  %v2080_v41 = vld [vmem:[%s4367_s2 + $0x530] sm:$0xff] }
 0x219   :  { %1402 = vmatpush2.msra.mxu0 %v4706_v53  ;;  %v2081_v53 = vld [vmem:[%s4367_s2 + $0x518] sm:$0xff] }
 0x21a   :  { %v1128_v34 = vrot.slane %v1127_v24, 2  ;;  %v1136_v54 = vadd.f32 %v1135_v28, %v1134_v21  ;;  %1403 = vmatprep.subr.mxu0 %v4707_v55  ;;  %v2074_v21 = vld [vmem:[%s4367_s2 + $0x590] sm:$0xff]  ;;  %v2085_v55 = vld [vmem:[%s4367_s2 + $0x4d8] sm:$0xff] }
 0x21b   :  { %1404 = vmatpush2.msra.mxu0 %v4708_v56  ;;  %v2078_v28 = vld [vmem:[%s4367_s2 + $0x550] sm:$0xff] }
 0x21c   :  { %v1129_v58 = vadd.f32 %v1128_v34, %v1127_v24  ;;  %v1137_v59 = vrot.slane %v1136_v54, 2  ;;  %1405 = vmatprep.subr.mxu0 %v4709_v60  ;;  %v2083_v34 = vld [vmem:[%s4367_s2 + $0x4f8] sm:$0xff]  ;;  %v2086_v56 = vld [vmem:[%s4367_s2 + $0x4d0] sm:$0xff] }
 0x21d   :  { %1406 = vmatpush2.msra.mxu0 %v4710_v61  ;;  %v2089_v60 = vld [vmem:[%s4367_s2 + $0x498] sm:$0xff]  ;;  %v2090_v61 = vld [vmem:[%s4367_s2 + $0x490] sm:$0xff] }
 0x21e   :  { %v1130_v62 = vrot.slane %v1129_v58, 1  ;;  %v1138_v63 = vadd.f32 %v1137_v59, %v1136_v54  ;;  %1407 = vmatprep.subr.mxu0 %v4711_v0  ;;  %v2084_v54 = vld [vmem:[%s4367_s2 + $0x4f0] sm:$0xff]  ;;  %v2093_v0 = vld [vmem:[%s4367_s2 + $0x458] sm:$0xff] }
 0x21f   :  { %1408 = vmatpush2.msra.mxu0 %v4712_v1  ;;  %v2088_v59 = vld [vmem:[%s4367_s2 + $0x4b0] sm:$0xff] }
 0x220   :  { %v1131_v38 = vadd.f32 %v1130_v62, %v1129_v58  ;;  %v1139_v2 = vrot.slane %v1138_v63, 1  ;;  %1409 = vmatprep.subr.mxu0 %v4713_v3  ;;  %v2087_v58 = vld [vmem:[%s4367_s2 + $0x4b8] sm:$0xff]  ;;  %v2094_v1 = vld [vmem:[%s4367_s2 + $0x450] sm:$0xff] }
 0x221   :  { %1410 = vmatpush2.msra.mxu0 %v4714_v4  ;;  %v2091_v62 = vld [vmem:[%s4367_s2 + $0x478] sm:$0xff]  ;;  %v2098_v4 = vld [vmem:[%s4367_s2 + $0x410] sm:$0xff] }
 0x222   :  { %v1143_v5 = vmul.f32 0.00048828125, %v1131_v38  ;;  %v1140_v6 = vadd.f32 %v1139_v2, %v1138_v63  ;;  %1411 = vmatprep.subr.mxu0 %v4715_v7  ;;  %v2092_v63 = vld [vmem:[%s4367_s2 + $0x470] sm:$0xff]  ;;  %v2095_v38 = vld [vmem:[%s4367_s2 + $0x438] sm:$0xff]  ;;  %v4722_v7 = vld [vmem:[#allocation74_spill] sm:$0xff] }
 0x223   :  { %1412 = vmatpush2.msra.mxu0 %v4716_v8  ;;  %v2096_v2 = vld [vmem:[%s4367_s2 + $0x430] sm:$0xff]  ;;  %v2097_v3 = vld [vmem:[%s4367_s2 + $0x418] sm:$0xff] }
 0x224   :  { %v1144_v9 = vmul.f32 0.00048828125, %v1140_v6  ;;  %1413 = vmatprep.subr.mxu0 %v4717_v10  ;;  %v4010_v12 = vsub.f32 %v2929_v46, %v1143_v5  ;;  %v4083_v20 = vsub.f32 %v4720_v19, %v1143_v5  ;;  %v4721_v6 = vld [vmem:[#allocation72_spill] sm:$0xff] }
 0x225   :  { %1414 = vmatpush2.msra.mxu0 %v4718_v11  ;;  %v4723_v8 = vld [vmem:[#allocation76_spill] sm:$0xff]  ;;  %v4726_v11 = vld [vmem:[#allocation82_spill] sm:$0xff] }
 0x226   :  { %1415 = vmatprep.subr.mxu0 %v3588_v39  ;;  %v4014_v14 = vsub.f32 %v4719_v13, %v1144_v9  ;;  %v4017_v15 = vsub.f32 %v2971_v40, %v1144_v9  ;;  %v4026_v46 = vmul.f32 %v4010_v12, %v4010_v12  ;;  %v4029_v39 = vsub.f32 %v2955_v44, %v1143_v5  ;;  %v2069_v44 = vld [vmem:[%s4367_s2 + $0x5d8] sm:$0xff]  ;;  %v4725_v10 = vld [vmem:[#allocation80_spill] sm:$0xff] }
 0x227   :  { %1416 = vmatpush2.msra.mxu0 %v3600_v43  ;;  %v2068_v43 = vld [vmem:[%s4367_s2 + $0x5f0] sm:$0xff]  ;;  %v4064_v17 = vsub.f32 %v3066_v49, %v1144_v9  ;;  %v2073_v49 = vld [vmem:[%s4367_s2 + $0x598] sm:$0xff]  ;;  %v4107_v24 = vmul.f32 %v4083_v20, %v4083_v20 }
 0x228   :  { %1417 = vmatprep.subr.mxu0 %v3612_v50  ;;  %v1164_v16 = vmul.f32 %v4014_v14, %v4014_v14  ;;  %v4034_v40 = vmul.f32 %v4017_v15, %v4017_v15  ;;  %v4037_v50 = vsub.f32 %v3009_v36, %v1144_v9  ;;  %v4050_v36 = vmul.f32 %v4029_v39, %v4029_v39  ;;  %v4724_v9 = vld [vmem:[#allocation78_spill] sm:$0xff]  ;;  %v4727_v13 = vld [vmem:[#allocation84_spill] sm:$0xff] }
 0x229   :  { %1418 = vmatpush2.msra.mxu0 %v3624_v30  ;;  %v4053_v30 = vsub.f32 %v2986_v52, %v1143_v5  ;;  %v2072_v52 = vld [vmem:[%s4367_s2 + $0x5b0] sm:$0xff]  ;;  %v2099_v5 = vld [vmem:[%s4367_s2 + $0x7f8] sm:$0xff] }
 0x22a   :  { %1330 = vmatprep.mubr.f32.mxu1 %v1164_v16  ;;  %1420 = vmatmul.mubr.f32.vlgmr.msra.gmra.mxu0 %v3902_v29  ;;  %v2070_v29 = vld [vmem:[%s4367_s2 + $0x5d0] sm:$0xff] }
 0x22b   :  { %1331 = vmatmul.mubr.f32.vlgmr.msra.gmra.mxu1 %v4026_v46  ;;  %1425 = vmatprep.mubr.f32.mxu0 %v3909_v47  ;;  %v4061_v47 = vmul.f32 %v4037_v50, %v4037_v50  ;;  %v4735_v19 = vld [vmem:[#allocation100_spill] sm:$0xff] }
 0x22c   :  { %1445 = vmatpush1.msra.mxu1 %v2068_v43  ;;  %1336 = vmatprep.mubr.f32.mxu1 %v4034_v40  ;;  %v4729_v43 = vld [vmem:[#allocation88_spill] sm:$0xff] }
 0x22d   :  { %1446 = vmatprep.subr.mxu1 %v2069_v44  ;;  %v4730_v44 = vld [vmem:[#allocation90_spill] sm:$0xff] }
 0x22e   :  { %1447 = vmatpush1.msra.mxu1 %v2070_v29  ;;  %1426 = vmatmul.mubr.f32.gmra.mxu0 %v3920_v45  ;;  %v4080_v45 = vmul.f32 %v4053_v30, %v4053_v30  ;;  %v4731_v29 = vld [vmem:[#allocation92_spill] sm:$0xff] }
 0x22f   :  { %1448 = vmatprep.subr.mxu1 %v2071_v18  ;;  %1337 = vmatmul.mubr.f32.gmra.mxu1 %v4050_v36  ;;  %v4732_v18 = vld [vmem:[#allocation94_spill] sm:$0xff] }
 0x230   :  { %1449 = vmatpush1.msra.mxu1 %v2072_v52  ;;  %1342 = vmatprep.mubr.f32.mxu1 %v4061_v47  ;;  %v4733_v52 = vld [vmem:[#allocation96_spill] sm:$0xff] }
 0x231   :  { %1431 = vmatprep.mubr.f32.mxu0 %v3928_v37  ;;  %1450 = vmatprep.subr.mxu1 %v2073_v49  ;;  %v4091_v37 = vmul.f32 %v4064_v17, %v4064_v17  ;;  %v4734_v49 = vld [vmem:[#allocation98_spill] sm:$0xff] }
 0x232   :  { %1451 = vmatpush1.msra.mxu1 %v2074_v21  ;;  %1432 = vmatmul.mubr.f32.gmra.mxu0 %v3940_v48  ;;  %v2077_v48 = vld [vmem:[%s4367_s2 + $0x558] sm:$0xff]  ;;  %v4736_v21 = vld [vmem:[#allocation102_spill] sm:$0xff] }
 0x233   :  { %1452 = vmatprep.subr.mxu1 %v2075_v22  ;;  %1343 = vmatmul.mubr.f32.gmra.mxu1 %v4080_v45  ;;  %v4737_v22 = vld [vmem:[#allocation104_spill] sm:$0xff] }
 0x234   :  { %1453 = vmatpush1.msra.mxu1 %v2076_v23  ;;  %1348 = vmatprep.mubr.f32.mxu1 %v4091_v37  ;;  %v4738_v23 = vld [vmem:[#allocation106_spill] sm:$0xff] }
 0x235   :  { %1437 = vmatprep.mubr.f32.mxu0 %v3948_v35  ;;  %1454 = vmatprep.subr.mxu1 %v2077_v48  ;;  %v2079_v35 = vld [vmem:[%s4367_s2 + $0x538] sm:$0xff]  ;;  %v4739_v48 = vld [vmem:[#allocation108_spill] sm:$0xff] }
 0x236   :  { %1455 = vmatpush1.msra.mxu1 %v2078_v28  ;;  %1438 = vmatmul.mubr.f32.gmra.mxu0 %v3957_v33  ;;  %v2082_v33 = vld [vmem:[%s4367_s2 + $0x510] sm:$0xff]  ;;  %v4740_v28 = vld [vmem:[#allocation110_spill] sm:$0xff] }
 0x237   :  { %1456 = vmatprep.subr.mxu1 %v2079_v35  ;;  %1349 = vmatmul.mubr.f32.gmra.mxu1 %v4107_v24  ;;  %v4741_v35 = vld [vmem:[#allocation112_spill] sm:$0xff] }
 0x238   :  { %1457 = vmatpush1.msra.mxu1 %v2080_v41  ;;  %1508 = vmatprep.mubr.f32.mxu1 %v1164_v16  ;;  %v4728_v16 = vld [vmem:[#allocation86_spill] sm:$0xff] }
 0x239   :  { %1458 = vmatprep.subr.mxu1 %v2081_v53  ;;  %v4742_v41 = vld [vmem:[#allocation114_spill] sm:$0xff]  ;;  %v4743_v53 = vld [vmem:[#allocation116_spill] sm:$0xff] }
 0x23a   :  { %1459 = vmatpush1.msra.mxu1 %v2082_v33  ;;  %v4744_v33 = vld [vmem:[#allocation118_spill] sm:$0xff] }
 0x23b   :  { %1460 = vmatprep.subr.mxu1 %v2083_v34  ;;  %v4745_v34 = vld [vmem:[#allocation120_spill] sm:$0xff] }
 0x23c   :  { %1461 = vmatpush1.msra.mxu1 %v2084_v54  ;;  %v4746_v54 = vld [vmem:[#allocation122_spill] sm:$0xff] }
 0x23d   :  { %1462 = vmatprep.subr.mxu1 %v2085_v55  ;;  %v4747_v55 = vld [vmem:[#allocation124_spill] sm:$0xff] }
 0x23e   :  { %1463 = vmatpush1.msra.mxu1 %v2086_v56  ;;  %v4748_v56 = vld [vmem:[#allocation125_spill] sm:$0xff] }
 0x23f   :  { %1464 = vmatprep.subr.mxu1 %v2087_v58  ;;  %v4749_v58 = vld [vmem:[#allocation126_spill] sm:$0xff] }
 0x240   :  { %1465 = vmatpush1.msra.mxu1 %v2088_v59  ;;  %v4750_v59 = vld [vmem:[#allocation127_spill] sm:$0xff] }
 0x241   :  { %1466 = vmatprep.subr.mxu1 %v2089_v60  ;;  %v4751_v60 = vld [vmem:[#allocation128_spill] sm:$0xff] }
 0x242   :  { %1467 = vmatpush1.msra.mxu1 %v2090_v61 }
 0x243   :  { %1468 = vmatprep.subr.mxu1 %v2091_v62 }
 0x244   :  { %1469 = vmatpush1.msra.mxu1 %v2092_v63 }
 0x245   :  { %1470 = vmatprep.subr.mxu1 %v2093_v0 }
 0x246   :  { %1471 = vmatpush1.msra.mxu1 %v2094_v1 }
 0x247   :  { %1472 = vmatprep.subr.mxu1 %v2095_v38 }
 0x248   :  { %1473 = vmatpush1.msra.mxu1 %v2096_v2 }
 0x249   :  { %1474 = vmatprep.subr.mxu1 %v2097_v3 }
 0x24a   :  { %1475 = vmatpush1.msra.mxu1 %v2098_v4 }
 0x24b   :  { %1476 = vmatprep.subr.mxu1 %v2099_v5 }
 0x24c   :  { %1477 = vmatpush2.msra.mxu1 %v4721_v6 }
 0x24d   :  { %1478 = vmatprep.subr.mxu1 %v4722_v7 }
 0x24e   :  { %1479 = vmatpush2.msra.mxu1 %v4723_v8 }
 0x24f   :  { %1480 = vmatprep.subr.mxu1 %v4724_v9 }
 0x250   :  { %1481 = vmatpush2.msra.mxu1 %v4725_v10 }
 0x251   :  { %1482 = vmatprep.subr.mxu1 %v4726_v11 }
 0x252   :  { %1483 = vmatpush2.msra.mxu1 %v4727_v13 }
 0x253   :  { %1484 = vmatprep.subr.mxu1 %v4728_v16 }
 0x254   :  { %1485 = vmatpush2.msra.mxu1 %v4729_v43 }
 0x255   :  { %1486 = vmatprep.subr.mxu1 %v4730_v44 }
 0x256   :  { %1487 = vmatpush2.msra.mxu1 %v4731_v29 }
 0x257   :  { %1488 = vmatprep.subr.mxu1 %v4732_v18 }
 0x258   :  { %1489 = vmatpush2.msra.mxu1 %v4733_v52 }
 0x259   :  { %1490 = vmatprep.subr.mxu1 %v4734_v49 }
 0x25a   :  { %1491 = vmatpush2.msra.mxu1 %v4735_v19 }
 0x25b   :  { %1492 = vmatprep.subr.mxu1 %v4736_v21 }
 0x25c   :  { %1493 = vmatpush2.msra.mxu1 %v4737_v22 }
 0x25d   :  { %1494 = vmatprep.subr.mxu1 %v4738_v23 }
 0x25e   :  { %1495 = vmatpush2.msra.mxu1 %v4739_v48 }
 0x25f   :  { %1496 = vmatprep.subr.mxu1 %v4740_v28 }
 0x260   :  { %1497 = vmatpush2.msra.mxu1 %v4741_v35 }
 0x261   :  { %1498 = vmatprep.subr.mxu1 %v4742_v41 }
 0x262   :  { %1499 = vmatpush2.msra.mxu1 %v4743_v53 }
 0x263   :  { %1500 = vmatprep.subr.mxu1 %v4744_v33 }
 0x264   :  { %1501 = vmatpush2.msra.mxu1 %v4745_v34 }
 0x265   :  { %1502 = vmatprep.subr.mxu1 %v4746_v54 }
 0x266   :  { %1503 = vmatpush2.msra.mxu1 %v4747_v55 }
 0x267   :  { %1504 = vmatprep.subr.mxu1 %v4748_v56 }
 0x268   :  { %1505 = vmatpush2.msra.mxu1 %v4749_v58 }
 0x269   :  { %1506 = vmatprep.subr.mxu1 %v4750_v59 }
 0x26a   :  { %1507 = vmatpush2.msra.mxu1 %v4751_v60 }
 0x26b   :  { %1509 = vmatmul.mubr.f32.vlgmr.msra.gmra.mxu1 %v4026_v46 }
 0x26c   :  { %1514 = vmatprep.mubr.f32.mxu1 %v4034_v40 }
 0x26f   :  { %1515 = vmatmul.mubr.f32.gmra.mxu1 %v4050_v36 }
 0x270   :  { %1520 = vmatprep.mubr.f32.mxu1 %v4061_v47 }
 0x273   :  { %1521 = vmatmul.mubr.f32.gmra.mxu1 %v4080_v45 }
 0x274   :  { %1526 = vmatprep.mubr.f32.mxu1 %v4091_v37 }
 0x277   :  { %1527 = vmatmul.mubr.f32.gmra.mxu1 %v4107_v24 }
 0x2aa   :  { %v1243_v61 = vpop.f32.mrf.mxu0 }
 0x2ac   :  { %v1245_v62 = vpop.f32.mrf.mxu0 }
 0x2ae   :  { %v1249_v0 = vpop.f32.mrf.mxu0 }
 0x2b0   :  { %v1251_v38 = vpop.f32.mrf.mxu0 }
 0x2b2   :  { %v1255_v46 = vpop.f32.mrf.mxu0 }
 0x2b4   :  { %v1257_v40 = vpop.f32.mrf.mxu0 }
 0x2b6   :  { %v1261_v36 = vpop.f32.mrf.mxu0 }
 0x2b8   :  { %v1263_v47 = vpop.f32.mrf.mxu0 }
 0x2ea   :  { %v1421_v45 = vpop.f32.mrf.mxu0 }
 0x2eb   :  { %v1332_v63 = vpop.f32.mrf.mxu1 }
 0x2ec   :  { %v1423_v10 = vpop.f32.mrf.mxu0  ;;  %v1333_v11 = vadd.f32 %v1332_v63, %v1243_v61 }
 0x2ed   :  { %v1334_v1 = vpop.f32.mrf.mxu1 }
 0x2ee   :  { %v1335_v8 = vadd.f32 %v1334_v1, %v1245_v62  ;;  %v1427_v52 = vpop.f32.mrf.mxu0 }
 0x2ef   :  { %v1338_v2 = vpop.f32.mrf.mxu1 }
 0x2f0   :  { %v1339_v24 = vadd.f32 %v1338_v2, %v1249_v0  ;;  %v1429_v22 = vpop.f32.mrf.mxu0 }
 0x2f1   :  { %v1340_v3 = vpop.f32.mrf.mxu1 }
 0x2f2   :  { %v1341_v7 = vadd.f32 %v1340_v3, %v1251_v38  ;;  %v1533_v44 = vadd.f32 %v1339_v24, %v1333_v11  ;;  %v1433_v35 = vpop.f32.mrf.mxu0 }
 0x2f3   :  { %v1344_v4 = vpop.f32.mrf.mxu1 }
 0x2f4   :  { %v1542_v13 = vadd.f32 %v1341_v7, %v1335_v8  ;;  %v1345_v16 = vadd.f32 %v1344_v4, %v1255_v46  ;;  %v1435_v54 = vpop.f32.mrf.mxu0 }
 0x2f5   :  { %v1346_v5 = vpop.f32.mrf.mxu1 }
 0x2f6   :  { %v1347_v9 = vadd.f32 %v1346_v5, %v1257_v40  ;;  %v1534_v49 = vadd.f32 %v1533_v44, %v1345_v16  ;;  %v1439_v0 = vpop.f32.mrf.mxu0 }
 0x2f7   :  { %v1350_v6 = vpop.f32.mrf.mxu1 }
 0x2f8   :  { %v1543_v29 = vadd.f32 %v1542_v13, %v1347_v9  ;;  %v1351_v18 = vadd.f32 %v1350_v6, %v1261_v36  ;;  %v1441_v6 = vpop.f32.mrf.mxu0 }
 0x2f9   :  { %v1352_v37 = vpop.f32.mrf.mxu1 }
 0x2fa   :  { %v1353_v43 = vadd.f32 %v1352_v37, %v1263_v47  ;;  %v1535_v21 = vadd.f32 %v1534_v49, %v1351_v18 }
 0x2fc   :  { %v1544_v19 = vadd.f32 %v1543_v29, %v1353_v43  ;;  %v1536_v28 = vrot.slane %v1535_v21, 4 }
 0x2fe   :  { %v1545_v23 = vrot.slane %v1544_v19, 4  ;;  %v1537_v34 = vadd.f32 %v1536_v28, %v1535_v21 }
 0x300   :  { %v1546_v53 = vadd.f32 %v1545_v23, %v1544_v19  ;;  %v1538_v60 = vrot.slane %v1537_v34, 2 }
 0x302   :  { %v1547_v56 = vrot.slane %v1546_v53, 2  ;;  %v1539_v4 = vadd.f32 %v1538_v60, %v1537_v34 }
 0x304   :  { %v1548_v38 = vadd.f32 %v1547_v56, %v1546_v53  ;;  %v2100_v56 = vmov 1966171168  }
 0x306   :  { %v1549_v37 = vrot.slane %v1548_v38, 1 }
 0x308   :  { %v1550_v16 = vadd.f32 %v1549_v37, %v1548_v38 }
 0x32b   :  { %v1510_v48 = vpop.f32.mrf.mxu1 }
 0x32c   :  { %v1511_v61 = vadd.f32 %v1510_v48, %v1421_v45  ;;  %v1540_v45 = vrot.slane %v1539_v4, 1 }
 0x32d   :  { %v1512_v41 = vpop.f32.mrf.mxu1 }
 0x32e   :  { %v1513_v2 = vadd.f32 %v1512_v41, %v1423_v10  ;;  %v1541_v10 = vadd.f32 %v1540_v45, %v1539_v4 }
 0x32f   :  { %v1516_v33 = vpop.f32.mrf.mxu1 }
 0x330   :  { %v1517_v58 = vadd.f32 %v1516_v33, %v1427_v52  ;;  %v1570_v52 = vmul.f32 0.00048828125, %v1550_v16  ;;  %v1569_v21 = vmul.f32 0.00048828125, %v1541_v10 }
 0x331   :  { %v1518_v55 = vpop.f32.mrf.mxu1 }
 0x332   :  { %v1519_v62 = vadd.f32 %v1518_v55, %v1429_v22  ;;  %v1551_v46 = vadd.f32 %v1517_v58, %v1511_v61  ;;  %v1575_v48 = vadd.f32 1e-05, %v1570_v52  ;;  %v1574_v41 = vadd.f32 1e-05, %v1569_v21 }
 0x333   :  { %v1522_v59 = vpop.f32.mrf.mxu1  ;;  %v1589_v58 = vunpack.c.l.s4 %v2100_v56 }
 0x334   :  { %v1523_v63 = vadd.f32 %v1522_v59, %v1433_v35  ;;  %v1560_v36 = vadd.f32 %v1519_v62, %v1513_v2  ;;  %1974 = vrsqrt.f32 %v1575_v48  ;;  %v1591_v59 = vlaneseq }
 0x335   :  { %v1524_v1 = vpop.f32.mrf.mxu1  ;;  %1976 = vrsqrt.f32 %v1574_v41  ;;  %v1590_v60 = vunpack.c.0.s8 %v1589_v58 }
 0x336   :  { %v1525_v3 = vadd.f32 %v1524_v1, %v1435_v54  ;;  %v1552_v5 = vadd.f32 %v1551_v46, %v1523_v63  ;;  %v1592_v61 = vshrl.u32 %v1591_v59, 7 }
 0x337   :  { %v1528_v40 = vpop.f32.mrf.mxu1 }
 0x338   :  { %v1529_v47 = vadd.f32 %v1528_v40, %v1439_v0  ;;  %v1561_v8 = vadd.f32 %v1560_v36, %v1525_v3  ;;  %v1593_v38 = vsub.s32 %v1590_v60, %v1592_v61  ;;  %v1573_v36 = vld [vmem:[%s4368_s3] sm:$0xf]  ;;  %v1623_v37 = vsub.s32 2, %v1592_v61 }
 0x339   :  { %v1530_v7 = vpop.f32.mrf.mxu1 }
 0x33a   :  { %v1553_v24 = vadd.f32 %v1552_v5, %v1529_v47  ;;  %v1531_v9 = vadd.f32 %v1530_v7, %v1441_v6  ;;  %v1615_v6 = vsub.s32 0, %v1592_v61  ;;  %v1619_v7 = vsub.s32 1, %v1592_v61 }
 0x33c   :  { %v1554_v11 = vrot.slane %v1553_v24, 4  ;;  %v1562_v13 = vadd.f32 %v1561_v8, %v1531_v9  ;;  %v1627_v8 = vsub.s32 3, %v1592_v61 }
 0x33e   :  { %v1555_v43 = vadd.f32 %v1554_v11, %v1553_v24  ;;  %v1563_v44 = vrot.slane %v1562_v13, 4  ;;  %v1649_v11 = vld [vmem:[%s4369_s4] sm:$0xf] }
 0x33f   :  { %v1654_v16 = vrot.slane %v1649_v11, %v1615_v6 }
 0x340   :  { %v1556_v29 = vrot.slane %v1555_v43, 2  ;;  %v1564_v18 = vadd.f32 %v1563_v44, %v1562_v13 }
 0x341   :  { %v1975_v62 = vpop.eup %1974 }
 0x342   :  { %v1557_v49 = vadd.f32 %v1556_v29, %v1555_v43  ;;  %v1565_v19 = vrot.slane %v1564_v18, 2  ;;  %v1977_v63 = vpop.eup %1976  ;;  %v1658_v43 = vrot.slane %v1649_v11, %v1619_v7 }
 0x343   :  { %v1586_v1 = vcombine.low %v1977_v63, %v1975_v62 }
 0x344   :  { %v1558_v22 = vrot.slane %v1557_v49, 1  ;;  %v1566_v23 = vadd.f32 %v1565_v19, %v1564_v18  ;;  %v1662_v18 = vrot.slane %v1649_v11, %v1623_v37 }
 0x345   :  { %v1594_v3 = vrot.slane %v1586_v1, %v1593_v38 }
 0x346   :  { %v1559_v28 = vadd.f32 %v1558_v22, %v1557_v49  ;;  %v1567_v35 = vrot.slane %v1566_v23, 1  ;;  %v1666_v49 = vrot.slane %v1649_v11, %v1627_v8 }
 0x348   :  { %v1571_v53 = vmul.f32 0.00048828125, %v1559_v28  ;;  %v1568_v33 = vadd.f32 %v1567_v35, %v1566_v23 }
 0x34a   :  { %v1576_v34 = vadd.f32 1e-05, %v1571_v53  ;;  %v1572_v54 = vmul.f32 0.00048828125, %v1568_v33 }
 0x34c   :  { %v1577_v55 = vadd.f32 1e-05, %v1572_v54  ;;  %1978 = vrsqrt.f32 %v1576_v34 }
 0x34e   :  { %1980 = vrsqrt.f32 %v1577_v55 }
 0x359   :  { %v1979_v0 = vpop.eup %1978 }
 0x35b   :  { %v1981_v2 = vpop.eup %1980 }
 0x35c   :  { %v1587_v46 = vcombine.low %v1979_v0, %v1981_v2 }
 0x35e   :  { %v1601_v40 = vrot.slane %v1587_v46, %v1593_v38 }
 0x360   :  { %v1602_v4 = vcombine.low %v1594_v3, %v1601_v40 }
 0x362   :  { %v1609_v5 = vrot.slane %v1602_v4, %v1593_v38 }
 0x364   :  { %v1611_v47 = vmul.f32 %v1609_v5, %v1573_v36 }
 0x366   :  { %v1616_v24 = vrot.slane %v1611_v47, %v1615_v6  ;;  %v1620_v9 = vrot.slane %v1611_v47, %v1619_v7  ;;  %v1624_v45 = vrot.slane %v1611_v47, %v1623_v37  ;;  %v1628_v13 = vrot.slane %v1611_v47, %v1627_v8 }
 0x368   :  { %v1633_v44 = vmul.f32 %v1616_v24, %v3890_v25  ;;  %v1634_v10 = vmul.f32 %v1620_v9, %v3893_v26  ;;  %v1635_v29 = vmul.f32 %v1624_v45, %v4010_v12  ;;  %v1636_v52 = vmul.f32 %v1628_v13, %v4014_v14 }
 0x369   :  { %v1637_v19 = vmul.f32 %v1616_v24, %v3905_v31  ;;  %v1638_v21 = vmul.f32 %v1620_v9, %v3896_v27  ;;  %v1639_v22 = vmul.f32 %v1624_v45, %v4029_v39  ;;  %v1640_v25 = vmul.f32 %v1628_v13, %v4017_v15 }
 0x36a   :  { %v4228_v23 = vadd.f32 %v1654_v16, %v1633_v44  ;;  %v4230_v48 = vadd.f32 %v1658_v43, %v1634_v10  ;;  %v4232_v28 = vadd.f32 %v1662_v18, %v1635_v29  ;;  %v4235_v26 = vadd.f32 %v1666_v49, %v1636_v52 }
 0x36b   :  { %v1641_v12 = vmul.f32 %v1616_v24, %v3923_v32  ;;  %v4238_v14 = vadd.f32 %v1654_v16, %v1637_v19  ;;  %v1642_v31 = vmul.f32 %v1620_v9, %v3912_v51  ;;  %v4241_v35 = vadd.f32 %v1658_v43, %v1638_v21 }
 0x36c   :  { %v4243_v27 = vadd.f32 %v1662_v18, %v1639_v22  ;;  %v1643_v39 = vmul.f32 %v1624_v45, %v4053_v30  ;;  %v1703_v41 = vmin.f32 %v4228_v23, 0.0  ;;  %v1704_v53 = vmin.f32 %v4230_v48, 0.0 }
 0x36d   :  { %v1705_v15 = vmin.f32 %v4232_v28, 0.0  ;;  %v1644_v33 = vmul.f32 %v1628_v13, %v4037_v50  ;;  %v4250_v34 = vadd.f32 %v1666_v49, %v1640_v25  ;;  %v1706_v32 = vmin.f32 %v4235_v26, 0.0 }
 0x36e   :  { %v1645_v51 = vmul.f32 %v1616_v24, %v3943_v57  ;;  %v1646_v54 = vmul.f32 %v1620_v9, %v3931_v42  ;;  %v4255_v55 = vadd.f32 %v1654_v16, %v1641_v12  ;;  %v1707_v30 = vmin.f32 %v4238_v14, 0.0 }
 0x36f   :  { %v1647_v56 = vmul.f32 %v1624_v45, %v4083_v20  ;;  %v4259_v58 = vadd.f32 %v1658_v43, %v1642_v31  ;;  %v1708_v59 = vmin.f32 %v4241_v35, 0.0  ;;  %v1709_v50 = vmin.f32 %v4243_v27, 0.0 }
 0x370   :  { %v4263_v60 = vadd.f32 %v1662_v18, %v1643_v39  ;;  %v1719_v61 = vmul.f32 1.442695, %v1703_v41  ;;  %v1721_v62 = vmul.f32 1.442695, %v1704_v53  ;;  %v1723_v63 = vmul.f32 1.442695, %v1705_v15 }
 0x371   :  { %v1648_v57 = vmul.f32 %v1628_v13, %v4064_v17  ;;  %v4266_v42 = vadd.f32 %v1666_v49, %v1644_v33  ;;  %v1710_v0 = vmin.f32 %v4250_v34, 0.0  ;;  %v1725_v1 = vmul.f32 1.442695, %v1706_v32 }
 0x372   :  { %v4269_v38 = vadd.f32 %v1654_v16, %v1645_v51  ;;  %v1711_v20 = vmin.f32 %v4255_v55, 0.0  ;;  %1982 = vpow2.f32 %v1719_v61  ;;  %v1727_v2 = vmul.f32 1.442695, %v1707_v30 }
 0x373   :  { %v4272_v46 = vadd.f32 %v1658_v43, %v1646_v54  ;;  %v1712_v3 = vmin.f32 %v4259_v58, 0.0  ;;  %1984 = vpow2.f32 %v1721_v62  ;;  %v1729_v40 = vmul.f32 1.442695, %v1708_v59 }
 0x374   :  { %v4275_v4 = vadd.f32 %v1662_v18, %v1647_v56  ;;  %v1713_v17 = vmin.f32 %v4263_v60, 0.0  ;;  %1986 = vpow2.f32 %v1723_v63  ;;  %v1731_v36 = vmul.f32 1.442695, %v1709_v50 }
 0x375   :  { %v4278_v5 = vadd.f32 %v1666_v49, %v1648_v57  ;;  %v1714_v47 = vmin.f32 %v4266_v42, 0.0  ;;  %1988 = vpow2.f32 %v1725_v1  ;;  %v1733_v6 = vmul.f32 1.442695, %v1710_v0 }
 0x376   :  { %v1715_v7 = vmin.f32 %v4269_v38, 0.0  ;;  %1990 = vpow2.f32 %v1727_v2  ;;  %v1735_v37 = vmul.f32 1.442695, %v1711_v20  ;;  %v1716_v8 = vmin.f32 %v4272_v46, 0.0 }
 0x377   :  { %1992 = vpow2.f32 %v1729_v40  ;;  %v1737_v24 = vmul.f32 1.442695, %v1712_v3  ;;  %v1717_v9 = vmin.f32 %v4275_v4, 0.0  ;;  %v1739_v45 = vmul.f32 1.442695, %v1713_v17 }
 0x378   :  { %1994 = vpow2.f32 %v1731_v36  ;;  %v1718_v11 = vmin.f32 %v4278_v5, 0.0  ;;  %v1741_v13 = vmul.f32 1.442695, %v1714_v47  ;;  %v1743_v16 = vmul.f32 1.442695, %v1715_v7 }
 0x379   :  { %1996 = vpow2.f32 %v1733_v6  ;;  %v1745_v43 = vmul.f32 1.442695, %v1716_v8  ;;  %v1747_v44 = vmul.f32 1.442695, %v1717_v9  ;;  %vm1687_vm2 = vcmp.gt.f32.partialorder %v4228_v23, 0.0 }
 0x37a   :  { %1998 = vpow2.f32 %v1735_v37  ;;  %v1749_v10 = vmul.f32 1.442695, %v1718_v11  ;;  %vm1688_vm3 = vcmp.gt.f32.partialorder %v4230_v48, 0.0  ;;  %vm1689_vm4 = vcmp.gt.f32.partialorder %v4232_v28, 0.0 }
 0x37b   :  { %2000 = vpow2.f32 %v1737_v24  ;;  %vm1690_vm5 = vcmp.gt.f32.partialorder %v4235_v26, 0.0  ;;  %vm1691_vm6 = vcmp.gt.f32.partialorder %v4238_v14, 0.0  ;;  %vm1692_vm7 = vcmp.gt.f32.partialorder %v4241_v35, 0.0 }
 0x37c   :  { %2002 = vpow2.f32 %v1739_v45  ;;  %vm1693_vm8 = vcmp.gt.f32.partialorder %v4243_v27, 0.0  ;;  %vm1694_vm9 = vcmp.gt.f32.partialorder %v4250_v34, 0.0  ;;  %vm1695_vm10 = vcmp.gt.f32.partialorder %v4255_v55, 0.0 }
 0x37d   :  { %2004 = vpow2.f32 %v1741_v13  ;;  %vm1696_vm11 = vcmp.gt.f32.partialorder %v4259_v58, 0.0  ;;  %vm1697_vm12 = vcmp.gt.f32.partialorder %v4263_v60, 0.0  ;;  %vm1698_vm13 = vcmp.gt.f32.partialorder %v4266_v42, 0.0 }
 0x37e   :  { %2006 = vpow2.f32 %v1743_v16  ;;  %vm1699_vm14 = vcmp.gt.f32.partialorder %v4269_v38, 0.0  ;;  %vm1700_vm15 = vcmp.gt.f32.partialorder %v4272_v46, 0.0  ;;  %vm1701_vm0 = vcmp.gt.f32.partialorder %v4275_v4, 0.0 }
 0x37f   :  { %v1983_v29 = vpop.eup %1982  ;;  %2008 = vpow2.f32 %v1745_v43  ;;  %vm1702_vm1 = vcmp.gt.f32.partialorder %v4278_v5, 0.0 }
 0x380   :  { %v1985_v18 = vpop.eup %1984  ;;  %2010 = vpow2.f32 %v1747_v44  ;;  %v1869_v52 = vadd.f32 -1.0, %v1983_v29 }
 0x381   :  { %v1987_v49 = vpop.eup %1986  ;;  %2012 = vpow2.f32 %v1749_v10  ;;  %v1870_v19 = vadd.f32 -1.0, %v1985_v18 }
 0x382   :  { %v1989_v21 = vpop.eup %1988  ;;  %v1871_v22 = vadd.f32 -1.0, %v1987_v49  ;;  %v1767_v25 = vsel %vm1687_vm2, %v4228_v23, %v1869_v52 }
 0x383   :  { %v1991_v12 = vpop.eup %1990  ;;  %v1872_v31 = vadd.f32 -1.0, %v1989_v21  ;;  %v1768_v39 = vsel %vm1688_vm3, %v4230_v48, %v1870_v19  ;;  %1783 = vst [vmem:[%s4370_s5] sm:$0xff] %v1767_v25 }
 0x384   :  { %v1993_v41 = vpop.eup %1992  ;;  %v1873_v53 = vadd.f32 -1.0, %v1991_v12  ;;  %v1769_v15 = vsel %vm1689_vm4, %v4232_v28, %v1871_v22  ;;  %1784 = vst [vmem:[%s4370_s5 + $0x8] sm:$0xff] %v1768_v39 }
 0x385   :  { %v1995_v23 = vpop.eup %1994  ;;  %v1874_v33 = vadd.f32 -1.0, %v1993_v41  ;;  %v1770_v48 = vsel %vm1690_vm5, %v4235_v26, %v1872_v31  ;;  %1785 = vst [vmem:[%s4370_s5 + $0x10] sm:$0xff] %v1769_v15 }
 0x386   :  { %v1997_v32 = vpop.eup %1996  ;;  %v1875_v51 = vadd.f32 -1.0, %v1995_v23  ;;  %v1771_v28 = vsel %vm1691_vm6, %v4238_v14, %v1873_v53  ;;  %1786 = vst [vmem:[%s4370_s5 + $0x18] sm:$0xff] %v1770_v48 }
 0x387   :  { %v1999_v54 = vpop.eup %1998  ;;  %v1876_v30 = vadd.f32 -1.0, %v1997_v32  ;;  %v1772_v26 = vsel %vm1692_vm7, %v4241_v35, %v1874_v33  ;;  %1787 = vst [vmem:[%s4370_s5 + $0x20] sm:$0xff] %v1771_v28 }
 0x388   :  { %v2001_v56 = vpop.eup %2000  ;;  %v1877_v59 = vadd.f32 -1.0, %v1999_v54  ;;  %v1773_v14 = vsel %vm1693_vm8, %v4243_v27, %v1875_v51  ;;  %1788 = vst [vmem:[%s4370_s5 + $0x28] sm:$0xff] %v1772_v26 }
 0x389   :  { %v2003_v50 = vpop.eup %2002  ;;  %v1878_v61 = vadd.f32 -1.0, %v2001_v56  ;;  %v1774_v35 = vsel %vm1694_vm9, %v4250_v34, %v1876_v30  ;;  %1789 = vst [vmem:[%s4370_s5 + $0x30] sm:$0xff] %v1773_v14 }
 0x38a   :  { %v2005_v62 = vpop.eup %2004  ;;  %v1879_v63 = vadd.f32 -1.0, %v2003_v50  ;;  %v1775_v27 = vsel %vm1695_vm10, %v4255_v55, %v1877_v59  ;;  %1790 = vst [vmem:[%s4370_s5 + $0x38] sm:$0xff] %v1774_v35 }
 0x38b   :  { %v2007_v57 = vpop.eup %2006  ;;  %v1880_v0 = vadd.f32 -1.0, %v2005_v62  ;;  %v1776_v34 = vsel %vm1696_vm11, %v4259_v58, %v1878_v61  ;;  %1791 = vst [vmem:[%s4370_s5 + $0x40] sm:$0xff] %v1775_v27 }
 0x38c   :  { %v2009_v1 = vpop.eup %2008  ;;  %v1881_v20 = vadd.f32 -1.0, %v2007_v57  ;;  %v1777_v55 = vsel %vm1697_vm12, %v4263_v60, %v1879_v63  ;;  %1792 = vst [vmem:[%s4370_s5 + $0x48] sm:$0xff] %v1776_v34 }
 0x38d   :  { %v2011_v2 = vpop.eup %2010  ;;  %v1882_v3 = vadd.f32 -1.0, %v2009_v1  ;;  %v1778_v58 = vsel %vm1698_vm13, %v4266_v42, %v1880_v0  ;;  %1793 = vst [vmem:[%s4370_s5 + $0x50] sm:$0xff] %v1777_v55 }
 0x38e   :  { %v2013_v40 = vpop.eup %2012  ;;  %v1883_v17 = vadd.f32 -1.0, %v2011_v2  ;;  %v1779_v60 = vsel %vm1699_vm14, %v4269_v38, %v1881_v20  ;;  %1794 = vst [vmem:[%s4370_s5 + $0x58] sm:$0xff] %v1778_v58 }
 0x38f   :  { %v1884_v36 = vadd.f32 -1.0, %v2013_v40  ;;  %v1780_v47 = vsel %vm1700_vm15, %v4272_v46, %v1882_v3  ;;  %1795 = vst [vmem:[%s4370_s5 + $0x60] sm:$0xff] %v1779_v60 }
 0x390   :  { %v1781_v42 = vsel %vm1701_vm0, %v4275_v4, %v1883_v17  ;;  %1796 = vst [vmem:[%s4370_s5 + $0x68] sm:$0xff] %v1780_v47 }
 0x391   :  { %v1782_v38 = vsel %vm1702_vm1, %v4278_v5, %v1884_v36  ;;  %1797 = vst [vmem:[%s4370_s5 + $0x70] sm:$0xff] %v1781_v42 }
 0x392   :  { %1798 = vst [vmem:[%s4370_s5 + $0x78] sm:$0xff] %v1782_v38 }

</bundles_post_ra>
